<compile_context>
chip_gen: v7x
topology: tpu7x:2x2x1
jax: 0.10.0
libtpu: 0.0.40
codegen_flags: <defaults>
</compile_context>

<pallas_src>
import functools

import jax
import jax.numpy as jnp
from jax import lax
from jax.experimental import pallas as pl
from jax.experimental.pallas import tpu as pltpu

BN_EPS = 1e-5
CP = 128                      # Cout padded to one full lane width
VMEM_LIMIT = 32 * 1024 * 1024


def _pick_tile(m_total):
    # Largest row tile that (a) divides M, (b) keeps the transposed output
    # lane-dense (multiple of 128). Falls back to one full-array tile.
    for cand in (2048, 1024, 512, 256, 128):
        if m_total % cand == 0:
            return cand
    return m_total


def conv_stats_kernel(p_ref, w_ref, y_ref, st_ref):
    # p_ref : (TM, 9*Cin) bf16  im2col patches
    # w_ref : (9*Cin, CP) bf16  conv weight, Cout zero-padded to CP lanes
    # y_ref : (TM, CP)    bf16  conv output (pre-BN)
    # st_ref: (2, CP)     f32   per-tile per-channel [sum, sum_of_squares]
    acc = jnp.dot(p_ref[...], w_ref[...], preferred_element_type=jnp.float32)
    y_ref[...] = acc.astype(y_ref.dtype)
    # BN partial stats from the f32 accumulator (before the bf16 store).
    # TODO(synk): E[x^2]-E[x]^2 can cancel when |mean| >> std; switch to a
    # centered (Chan) combination if BN accuracy ever becomes an issue.
    st_ref[...] = jnp.concatenate(
        [jnp.sum(acc, axis=0, keepdims=True),
         jnp.sum(acc * acc, axis=0, keepdims=True)], axis=0)


def bn_add_proj_kernel(y_ref, xc_ref, wsc_ref, scale_ref, shift_ref, o_ref):
    # Fused BN affine + ReLU, 1x1 shortcut projection, add, final ReLU.
    # Output stored transposed -> lane-dense (Cout, TM), only real channels.
    main = jnp.maximum(
        y_ref[...].astype(jnp.float32) * scale_ref[...] + shift_ref[...], 0.0)
    sc = jnp.dot(xc_ref[...], wsc_ref[...], preferred_element_type=jnp.float32)
    out = jnp.maximum(main + sc, 0.0)                 # (TM, CP) f32
    o_ref[...] = out.T[:o_ref.shape[0], :]            # (Cout, TM)


def bn_add_identity_kernel(y_ref, xc_ref, scale_ref, shift_ref, o_ref):
    # Identity shortcut: add the raw f32 x center exactly (no bf16 rounding).
    main = jnp.maximum(
        y_ref[...].astype(jnp.float32) * scale_ref[...] + shift_ref[...], 0.0)
    xc = xc_ref[...]                                  # (TM, Cin == Cout) f32
    if xc.shape[1] == CP:
        sc = xc
    else:
        sc = jnp.concatenate(
            [xc, jnp.zeros((xc.shape[0], CP - xc.shape[1]), jnp.float32)],
            axis=-1)
    out = jnp.maximum(main + sc, 0.0)
    o_ref[...] = out.T[:o_ref.shape[0], :]


@jax.jit
def residual_block(x_nchw, w_oihw, gamma, beta, w_sc_oihw=None):
    """ResidualBlock forward.
    x_nchw: (N, Cin, H, W); w_oihw: (Cout, Cin, 3, 3);
    w_sc_oihw: (Cout, Cin, 1, 1) 1x1 shortcut conv weight, or None (identity,
    requires Cin == Cout)."""
    N, Cin, H, W = x_nchw.shape
    Cout = w_oihw.shape[0]
    assert Cout <= CP and Cin <= CP, "channel tiling beyond 128 not implemented"
    if w_sc_oihw is None:
        assert Cin == Cout, "identity shortcut requires Cin == Cout"

    KC = 9 * Cin
    M_total = N * H * W
    TM = _pick_tile(M_total)
    T = M_total // TM

    # ---- wrapper glue: bf16 NHWC, im2col patches, weight repack ----
    x_nhwc = jnp.transpose(x_nchw, (0, 2, 3, 1))
    x_bf = x_nhwc.astype(jnp.bfloat16)
    x_pad = jnp.pad(x_bf, ((0, 0), (1, 1), (1, 1), (0, 0)))
    patches = jnp.concatenate(
        [x_pad[:, kh:kh + H, kw:kw + W, :]
         for kh in range(3) for kw in range(3)], axis=-1).reshape(M_total, KC)

    # conv weight OIHW -> (9*Cin, CP) bf16, Cout zero-padded to lane width
    w = jnp.transpose(w_oihw, (2, 3, 1, 0)).reshape(KC, Cout)
    w = jnp.pad(w, ((0, 0), (0, CP - Cout))).astype(jnp.bfloat16)

    # ---- pass 1: conv + per-tile BN partial stats ----
    flops1 = 2 * M_total * KC * CP
    bytes1 = (patches.size * 2 + w.size * 2
              + M_total * CP * 2 + T * 2 * CP * 4)
    y, st = pl.pallas_call(
        conv_stats_kernel,
        out_shape=(
            jax.ShapeDtypeStruct((M_total, CP), jnp.bfloat16),
            jax.ShapeDtypeStruct((T, 2, CP), jnp.float32),
        ),
        grid=(T,),
        in_specs=[
            pl.BlockSpec((TM, KC), lambda i: (i, 0)),
            pl.BlockSpec((KC, CP), lambda i: (0, 0)),
        ],
        out_specs=(
            pl.BlockSpec((TM, CP), lambda i: (i, 0)),
            pl.BlockSpec((None, 2, CP), lambda i: (i, 0, 0)),
        ),
        compiler_params=pltpu.CompilerParams(
            dimension_semantics=("parallel",),
            vmem_limit_bytes=VMEM_LIMIT),
        cost_estimate=pl.CostEstimate(flops=int(flops1), transcendentals=0,
                                      bytes_accessed=int(bytes1)),
    )(patches, w)

    # ---- tiny cross-tile reduction + BN affine fold (plain JAX, (2, CP)) ----
    sums = jnp.sum(st, axis=0)                            # (2, CP)
    cnt = jnp.float32(M_total)
    mean = sums[0] / cnt
    var = jnp.maximum(sums[1] / cnt - mean * mean, 0.0)
    inv = lax.rsqrt(var + BN_EPS)
    g = jnp.pad(gamma.astype(jnp.float32), (0, CP - Cout))
    bt = jnp.pad(beta.astype(jnp.float32), (0, CP - Cout))
    scale = (g * inv).reshape(1, CP)
    shift = (bt - mean * g * inv).reshape(1, CP)

    # ---- pass 2: BN + ReLU + shortcut add + ReLU, lane-dense (Cout, TM) out ----
    common = dict(
        out_shape=jax.ShapeDtypeStruct((Cout, M_total), jnp.float32),
        grid=(T,),
        out_specs=pl.BlockSpec((Cout, TM), lambda i: (0, i)),
        compiler_params=pltpu.CompilerParams(
            dimension_semantics=("parallel",),
            vmem_limit_bytes=VMEM_LIMIT),
    )
    if w_sc_oihw is None:
        xc = x_nhwc.astype(jnp.float32).reshape(M_total, Cin)   # exact identity add
        bytes2 = M_total * CP * 2 + xc.size * 4 + Cout * M_total * 4
        out_t = pl.pallas_call(
            bn_add_identity_kernel,
            in_specs=[
                pl.BlockSpec((TM, CP), lambda i: (i, 0)),
                pl.BlockSpec((TM, Cin), lambda i: (i, 0)),
                pl.BlockSpec((1, CP), lambda i: (0, 0)),
                pl.BlockSpec((1, CP), lambda i: (0, 0)),
            ],
            cost_estimate=pl.CostEstimate(flops=int(4 * M_total * CP),
                                          transcendentals=0,
                                          bytes_accessed=int(bytes2)),
            **common,
        )(y, xc, scale, shift)
    else:
        xc = x_bf.reshape(M_total, Cin)                          # bf16 center-x
        w_sc = jnp.transpose(w_sc_oihw.reshape(Cout, Cin), (1, 0))
        w_sc = jnp.pad(w_sc, ((0, 0), (0, CP - Cout))).astype(jnp.bfloat16)
        bytes2 = M_total * CP * 2 + xc.size * 2 + w_sc.size * 2 + Cout * M_total * 4
        out_t = pl.pallas_call(
            bn_add_proj_kernel,
            in_specs=[
                pl.BlockSpec((TM, CP), lambda i: (i, 0)),
                pl.BlockSpec((TM, Cin), lambda i: (i, 0)),
                pl.BlockSpec((Cin, CP), lambda i: (0, 0)),
                pl.BlockSpec((1, CP), lambda i: (0, 0)),
                pl.BlockSpec((1, CP), lambda i: (0, 0)),
            ],
            cost_estimate=pl.CostEstimate(
                flops=int(2 * M_total * Cin * CP + 4 * M_total * CP),
                transcendentals=0, bytes_accessed=int(bytes2)),
            **common,
        )(y, xc, w_sc, scale, shift)

    # Epilogue touches only the real Cout*M data (no 128-lane padded round trip).
    out = out_t.reshape(Cout, N, H, W)
    return jnp.transpose(out, (1, 0, 2, 3)).astype(x_nchw.dtype)


def reference(x, w, gamma, beta, w_sc=None):
    """Pure-JAX reference of ResidualBlock forward (training-mode BN)."""
    xf = x.astype(jnp.float32)
    y = lax.conv_general_dilated(
        xf, w.astype(jnp.float32), window_strides=(1, 1),
        padding=[(1, 1), (1, 1)],
        dimension_numbers=("NCHW", "OIHW", "NCHW"),
        precision=lax.Precision.HIGHEST)
    mean = jnp.mean(y, axis=(0, 2, 3), keepdims=True)
    var = jnp.mean((y - mean) ** 2, axis=(0, 2, 3), keepdims=True)
    y = (y - mean) * lax.rsqrt(var + BN_EPS)
    y = y * gamma.reshape(1, -1, 1, 1) + beta.reshape(1, -1, 1, 1)
    main = jnp.maximum(y, 0.0)
    if w_sc is None:
        short = xf
    else:
        short = lax.conv_general_dilated(
            xf, w_sc.astype(jnp.float32), window_strides=(1, 1),
            padding=[(0, 0), (0, 0)],
            dimension_numbers=("NCHW", "OIHW", "NCHW"),
            precision=lax.Precision.HIGHEST)
    return jnp.maximum(main + short, 0.0)


if __name__ == "__main__":
    # Small shapes consistent with the module: N=2, Cin=4, H=W=16, Cout=8.
    N, Cin, H, W, Cout = 2, 4, 16, 16, 8

    key = jax.random.PRNGKey(0)
    kx, kw, ks, kg, kb = jax.random.split(key, 5)
    x = jax.random.normal(kx, (N, Cin, H, W), jnp.float32)
    w = jax.random.normal(kw, (Cout, Cin, 3, 3), jnp.float32) * 0.1
    w_sc = jax.random.normal(ks, (Cout, Cin, 1, 1), jnp.float32) * 0.1
    gamma = (1.0 + 0.1 * jax.random.normal(kg, (Cout,))).astype(jnp.float32)
    beta = (0.1 * jax.random.normal(kb, (Cout,))).astype(jnp.float32)

    # 1x1-conv shortcut branch (Cin != Cout)
    out = jax.block_until_ready(residual_block(x, w, gamma, beta, w_sc))
    ref = jax.block_until_ready(reference(x, w, gamma, beta, w_sc))
    assert out.shape == (N, Cout, H, W)
    err = float(jnp.max(jnp.abs(out - ref)))
    assert jnp.allclose(out, ref, atol=2e-2, rtol=2e-2), err

    # identity shortcut branch (Cin == Cout), matching nn.Identity in the module
    Ci2 = 8
    kx2, kw2 = jax.random.split(kb, 2)
    x2 = jax.random.normal(kx2, (N, Ci2, H, W), jnp.float32)
    w2 = jax.random.normal(kw2, (Ci2, Ci2, 3, 3), jnp.float32) * 0.1
    out2 = jax.block_until_ready(residual_block(x2, w2, gamma, beta, None))
    ref2 = jax.block_until_ready(reference(x2, w2, gamma, beta, None))
    err2 = float(jnp.max(jnp.abs(out2 - ref2)))
    assert jnp.allclose(out2, ref2, atol=2e-2, rtol=2e-2), err2

    print("KERNEL_OK")
</pallas_src>

<mosaic_0001>
module attributes {stable_mosaic.version = 11 : i64} {
  func.func @conv_stats_kernel(%arg0: i32, %arg1: memref<512x36xbf16, #tpu.memory_space<vmem>>, %arg2: memref<36x128xbf16, #tpu.memory_space<vmem>>, %arg3: memref<512x128xbf16, #tpu.memory_space<vmem>>, %arg4: memref<1x2x128xf32, #tpu.memory_space<vmem>>) attributes {dimension_semantics = [#tpu.dimension_semantics<parallel>], iteration_bounds = array<i64: 1>, scalar_prefetch = 0 : i64, scratch_operands = 0 : i64, tpu.core_type = #tpu.core_type<tc>, window_params = [{transform_indices = @transform_0, window_bounds = array<i64: 512, 36>}, {pipeline_mode = #tpu.pipeline_mode<synchronous>, transform_indices = @transform_1, window_bounds = array<i64: 36, 128>}, {transform_indices = @transform_2, window_bounds = array<i64: 512, 128>}, {transform_indices = @transform_3, window_bounds = array<i64: 1, 2, 128>}]} {
    %c0 = arith.constant 0 : index
    %c0_0 = arith.constant 0 : index
    %0 = vector.load %arg1[%c0, %c0_0] : memref<512x36xbf16, #tpu.memory_space<vmem>>, vector<512x36xbf16>
    %c0_1 = arith.constant 0 : index
    %c0_2 = arith.constant 0 : index
    %1 = vector.load %arg2[%c0_1, %c0_2] : memref<36x128xbf16, #tpu.memory_space<vmem>>, vector<36x128xbf16>
    %cst = arith.constant dense<0.000000e+00> : vector<512x128xf32>
    %2 = tpu.matmul %0, %1, %cst {dimension_numbers = #tpu.dot_dimension_numbers<[1], [0], [0], [1], [0, 0, 1, 1], [], []>} : vector<512x36xbf16>, vector<36x128xbf16>, vector<512x128xf32> -> vector<512x128xf32>
    %3 = arith.truncf %2 : vector<512x128xf32> to vector<512x128xbf16>
    %c0_3 = arith.constant 0 : index
    %c0_4 = arith.constant 0 : index
    %4 = vector.load %arg3[%c0_3, %c0_4] : memref<512x128xbf16, #tpu.memory_space<vmem>>, vector<512x128xbf16>
    tpu.vector_store %arg3[%c0_3, %c0_4], %3 {strides = array<i32>} : memref<512x128xbf16, #tpu.memory_space<vmem>>, vector<512x128xbf16>,
    %cst_5 = arith.constant dense<0.000000e+00> : vector<128xf32>
    %5 = vector.multi_reduction <add>, %2, %cst_5 [0] : vector<512x128xf32> to vector<128xf32>
    %6 = vector.shape_cast %5 : vector<128xf32> to vector<1x128xf32>
    %7 = arith.mulf %2, %2 : vector<512x128xf32>
    %cst_6 = arith.constant dense<0.000000e+00> : vector<128xf32>
    %8 = vector.multi_reduction <add>, %7, %cst_6 [0] : vector<512x128xf32> to vector<128xf32>
    %9 = vector.shape_cast %8 : vector<128xf32> to vector<1x128xf32>
    %10 = tpu.concatenate %6, %9 in 0 : vector<1x128xf32>, vector<1x128xf32> -> vector<2x128xf32>
    %c0_7 = arith.constant 0 : index
    %c0_8 = arith.constant 0 : index
    %c0_9 = arith.constant 0 : index
    %11 = vector.load %arg4[%c0_7, %c0_8, %c0_9] : memref<1x2x128xf32, #tpu.memory_space<vmem>>, vector<1x2x128xf32>
    %12 = vector.shape_cast %11 : vector<1x2x128xf32> to vector<2x128xf32>
    %13 = vector.shape_cast %10 : vector<2x128xf32> to vector<1x2x128xf32>
    tpu.vector_store %arg4[%c0_7, %c0_8, %c0_9], %13 {strides = array<i32>} : memref<1x2x128xf32, #tpu.memory_space<vmem>>, vector<1x2x128xf32>,
    return
  }
  func.func @transform_0(%arg0: i32) -> (i32, i32) {
    %c0_i32 = arith.constant 0 : i32
    %c0_i32_0 = arith.constant 0 : i32
    return %arg0, %c0_i32 : i32, i32
  }
  func.func @transform_1(%arg0: i32) -> (i32, i32) {
    %c0_i32 = arith.constant 0 : i32
    %c0_i32_0 = arith.constant 0 : i32
    %c0_i32_1 = arith.constant 0 : i32
    return %c0_i32, %c0_i32_0 : i32, i32
  }
  func.func @transform_2(%arg0: i32) -> (i32, i32) {
    %c0_i32 = arith.constant 0 : i32
    %c0_i32_0 = arith.constant 0 : i32
    return %arg0, %c0_i32 : i32, i32
  }
  func.func @transform_3(%arg0: i32) -> (i32, i32, i32) {
    %c0_i32 = arith.constant 0 : i32
    %c0_i32_0 = arith.constant 0 : i32
    %c0_i32_1 = arith.constant 0 : i32
    return %arg0, %c0_i32, %c0_i32_0 : i32, i32, i32
  }
}

module attributes {stable_mosaic.version = 11 : i64} {
  func.func @bn_add_proj_kernel(%arg0: i32, %arg1: memref<512x128xbf16, #tpu.memory_space<vmem>>, %arg2: memref<512x4xbf16, #tpu.memory_space<vmem>>, %arg3: memref<4x128xbf16, #tpu.memory_space<vmem>>, %arg4: memref<1x128xf32, #tpu.memory_space<vmem>>, %arg5: memref<1x128xf32, #tpu.memory_space<vmem>>, %arg6: memref<8x512xf32, #tpu.memory_space<vmem>>) attributes {dimension_semantics = [#tpu.dimension_semantics<parallel>], iteration_bounds = array<i64: 1>, scalar_prefetch = 0 : i64, scratch_operands = 0 : i64, tpu.core_type = #tpu.core_type<tc>, window_params = [{transform_indices = @transform_0, window_bounds = array<i64: 512, 128>}, {transform_indices = @transform_1, window_bounds = array<i64: 512, 4>}, {pipeline_mode = #tpu.pipeline_mode<synchronous>, transform_indices = @transform_2, window_bounds = array<i64: 4, 128>}, {pipeline_mode = #tpu.pipeline_mode<synchronous>, transform_indices = @transform_3, window_bounds = array<i64: 1, 128>}, {pipeline_mode = #tpu.pipeline_mode<synchronous>, transform_indices = @transform_4, window_bounds = array<i64: 1, 128>}, {transform_indices = @transform_5, window_bounds = array<i64: 8, 512>}]} {
    %c0 = arith.constant 0 : index
    %c0_0 = arith.constant 0 : index
    %0 = vector.load %arg1[%c0, %c0_0] : memref<512x128xbf16, #tpu.memory_space<vmem>>, vector<512x128xbf16>
    %1 = arith.extf %0 : vector<512x128xbf16> to vector<512x128xf32>
    %c0_1 = arith.constant 0 : index
    %c0_2 = arith.constant 0 : index
    %2 = vector.load %arg4[%c0_1, %c0_2] : memref<1x128xf32, #tpu.memory_space<vmem>>, vector<1x128xf32>
    %3 = vector.broadcast %2 : vector<1x128xf32> to vector<512x128xf32>
    %4 = arith.mulf %1, %3 : vector<512x128xf32>
    %c0_3 = arith.constant 0 : index
    %c0_4 = arith.constant 0 : index
    %5 = vector.load %arg5[%c0_3, %c0_4] : memref<1x128xf32, #tpu.memory_space<vmem>>, vector<1x128xf32>
    %6 = vector.broadcast %5 : vector<1x128xf32> to vector<512x128xf32>
    %7 = arith.addf %4, %6 : vector<512x128xf32>
    %cst = arith.constant 0.000000e+00 : f32
    %8 = vector.broadcast %cst : f32 to vector<512x128xf32>
    %9 = arith.maximumf %7, %8 : vector<512x128xf32>
    %c0_5 = arith.constant 0 : index
    %c0_6 = arith.constant 0 : index
    %10 = vector.load %arg2[%c0_5, %c0_6] : memref<512x4xbf16, #tpu.memory_space<vmem>>, vector<512x4xbf16>
    %c0_7 = arith.constant 0 : index
    %c0_8 = arith.constant 0 : index
    %11 = vector.load %arg3[%c0_7, %c0_8] : memref<4x128xbf16, #tpu.memory_space<vmem>>, vector<4x128xbf16>
    %cst_9 = arith.constant dense<0.000000e+00> : vector<512x128xf32>
    %12 = tpu.matmul %10, %11, %cst_9 {dimension_numbers = #tpu.dot_dimension_numbers<[1], [0], [0], [1], [0, 0, 1, 1], [], []>} : vector<512x4xbf16>, vector<4x128xbf16>, vector<512x128xf32> -> vector<512x128xf32>
    %13 = arith.addf %9, %12 : vector<512x128xf32>
    %cst_10 = arith.constant 0.000000e+00 : f32
    %14 = vector.broadcast %cst_10 : f32 to vector<512x128xf32>
    %15 = arith.maximumf %13, %14 : vector<512x128xf32>
    %16 = tpu.transpose %15, [1, 0] : vector<512x128xf32> -> vector<128x512xf32>
    %17 = vector.extract_strided_slice %16 {offsets = [0, 0], sizes = [8, 512], strides = [1, 1]} : vector<128x512xf32> to vector<8x512xf32>
    %c0_11 = arith.constant 0 : index
    %c0_12 = arith.constant 0 : index
    %18 = vector.load %arg6[%c0_11, %c0_12] : memref<8x512xf32, #tpu.memory_space<vmem>>, vector<8x512xf32>
    tpu.vector_store %arg6[%c0_11, %c0_12], %17 {strides = array<i32>} : memref<8x512xf32, #tpu.memory_space<vmem>>, vector<8x512xf32>,
    return
  }
  func.func @transform_0(%arg0: i32) -> (i32, i32) {
    %c0_i32 = arith.constant 0 : i32
    %c0_i32_0 = arith.constant 0 : i32
    return %arg0, %c0_i32 : i32, i32
  }
  func.func @transform_1(%arg0: i32) -> (i32, i32) {
    %c0_i32 = arith.constant 0 : i32
    %c0_i32_0 = arith.constant 0 : i32
    return %arg0, %c0_i32 : i32, i32
  }
  func.func @transform_2(%arg0: i32) -> (i32, i32) {
    %c0_i32 = arith.constant 0 : i32
    %c0_i32_0 = arith.constant 0 : i32
    %c0_i32_1 = arith.constant 0 : i32
    return %c0_i32, %c0_i32_0 : i32, i32
  }
  func.func @transform_3(%arg0: i32) -> (i32, i32) {
    %c0_i32 = arith.constant 0 : i32
    %c0_i32_0 = arith.constant 0 : i32
    %c0_i32_1 = arith.constant 0 : i32
    return %c0_i32, %c0_i32_0 : i32, i32
  }
  func.func @transform_4(%arg0: i32) -> (i32, i32) {
    %c0_i32 = arith.constant 0 : i32
    %c0_i32_0 = arith.constant 0 : i32
    %c0_i32_1 = arith.constant 0 : i32
    return %c0_i32, %c0_i32_0 : i32, i32
  }
  func.func @transform_5(%arg0: i32) -> (i32, i32) {
    %c0_i32 = arith.constant 0 : i32
    %c0_i32_0 = arith.constant 0 : i32
    return %c0_i32, %arg0 : i32, i32
  }
}

</mosaic_0001>

<bundles_post_ra>
// kernel: residual_block.2
= control target key start
LH: loop header
LB: loop body
LE: loop exit
PB: predicated region body
PF: predicated region fallthrough
CT: control target
= control target key end

     0   :  { %vm258_vm0 = vcmask 293888   ;;  %vm355_vm1 = vcmask 1041408   ;;  %vm1170_vm2 = vcmask 1040384   ;;  %s2163_s1 = inlined_call_operand.vmem [shape: bf16[36,128], index: 1, kind: input, shape index: {}]   ;;  %s2164_s0 = inlined_call_operand.vmem [shape: bf16[512,36], index: 0, kind: input, shape index: {}]   ;;  %s2165_s2 = inlined_call_operand.vmem [shape: bf16[512,128], index: 2, kind: output, shape index: {0}]   ;;  %s2166_s3 = inlined_call_operand.vmem [shape: f32[1,2,128], index: 3, kind: output, shape index: {1}]  }
   0x1   :  { %v1680_v0 = vld [vmem:[%s2163_s1] sm:$0xff]   ;;  %v1681_v1 = vld [vmem:[%s2163_s1 + $0x8] sm:$0xff]   ;;  %v1682_v2 = vld [vmem:[%s2163_s1 + $0x10] ss:$0 sps:$4 sm:$0x33]  }
   0x2   :  { %1602 = vmatprep.subr.bf16.mxu0 %v1680_v0  ;;  %v1683_v3 = vld [vmem:[%s2164_s0] sm:$0xff]   ;;  %1672 = vmatprep.subr.bf16.mxu1 %v1680_v0  ;;  %v357_v4 = vsel %vm355_vm1, %v1682_v2, 0  ;;  %v1684_v5 = vld [vmem:[%s2164_s0 + $0x8] sm:$0xff]   ;;  %v1685_v6 = vld [vmem:[%s2164_s0 + $0x10] sm:$0xff]  }
   0x3   :  { %1603 = vmatpush3.bf16.msra.mxu0 %v1680_v0  ;;  %1675 = vmatpush3.bf16.msra.mxu1 %v1680_v0  ;;  %v1686_v7 = vld [vmem:[%s2164_s0 + $0x18] sm:$0xff]   ;;  %v1687_v8 = vld [vmem:[%s2164_s0 + $0x20] sm:$0xff]   ;;  %v1700_v10 = vld [vmem:[%s2164_s0 + $0x88] sm:$0xff]  }
   0x4   :  { %1604 = vmatprep.subr.bf16.mxu0 %v1681_v1  ;;  %1608 = vmatprep.mubr.msk.bf16.mxu0 %vm258_vm0, %v1683_v3  ;;  %v1699_v9 = vld [vmem:[%s2164_s0 + $0x80] sm:$0xff]   ;;  %v1701_v11 = vld [vmem:[%s2164_s0 + $0x90] sm:$0xff]   ;;  %v1688_v12 = vld [vmem:[%s2164_s0 + $0x28] sm:$0xff]  }
   0x5   :  { %1673 = vmatprep.subr.bf16.mxu1 %v1681_v1  ;;  %1640 = vmatprep.mubr.msk.bf16.mxu1 %vm258_vm0, %v1699_v9  ;;  %v1689_v13 = vld [vmem:[%s2164_s0 + $0x30] sm:$0xff]   ;;  %v1702_v14 = vld [vmem:[%s2164_s0 + $0x98] sm:$0xff]   ;;  %v1703_v15 = vld [vmem:[%s2164_s0 + $0xa0] sm:$0xff]  }
   0x6   :  { %v1690_v16 = vld [vmem:[%s2164_s0 + $0x38] sm:$0xff]   ;;  %v1704_v17 = vld [vmem:[%s2164_s0 + $0xa8] sm:$0xff]   ;;  %v1691_v18 = vld [vmem:[%s2164_s0 + $0x40] sm:$0xff]  }
   0x7   :  { %1605 = vmatpush3.bf16.msra.mxu0 %v1681_v1  ;;  %1676 = vmatpush3.bf16.msra.mxu1 %v1681_v1  ;;  %v1705_v19 = vld [vmem:[%s2164_s0 + $0xb0] sm:$0xff]   ;;  %v1692_v20 = vld [vmem:[%s2164_s0 + $0x48] sm:$0xff]   ;;  %v1706_v21 = vld [vmem:[%s2164_s0 + $0xb8] sm:$0xff]  }
   0x8   :  { %1678 = vmatprep.subr.msk.bf16.mxu0 %vm355_vm1, %v1682_v2  ;;  %1679 = vmatprep.subr.msk.bf16.mxu1 %vm355_vm1, %v1682_v2  ;;  %v1693_v22 = vld [vmem:[%s2164_s0 + $0x50] sm:$0xff]   ;;  %v1707_v23 = vld [vmem:[%s2164_s0 + $0xc0] sm:$0xff]   ;;  %v1694_v24 = vld [vmem:[%s2164_s0 + $0x58] sm:$0xff]  }
   0x9   :  { %v1708_v25 = vld [vmem:[%s2164_s0 + $0xc8] sm:$0xff]   ;;  %v1695_v26 = vld [vmem:[%s2164_s0 + $0x60] sm:$0xff]   ;;  %v1709_v27 = vld [vmem:[%s2164_s0 + $0xd0] sm:$0xff]  }
   0xa   :  { %v1696_v28 = vld [vmem:[%s2164_s0 + $0x68] sm:$0xff]   ;;  %v1710_v29 = vld [vmem:[%s2164_s0 + $0xd8] sm:$0xff]   ;;  %v1697_v30 = vld [vmem:[%s2164_s0 + $0x70] sm:$0xff]  }
   0xb   :  { %1607 = vmatpush3.bf16.msra.mxu0 %v357_v4  ;;  %1677 = vmatpush3.bf16.msra.mxu1 %v357_v4  ;;  %v1711_v31 = vld [vmem:[%s2164_s0 + $0xe0] sm:$0xff]   ;;  %v1698_v32 = vld [vmem:[%s2164_s0 + $0x78] sm:$0xff]   ;;  %v1712_v33 = vld [vmem:[%s2164_s0 + $0xe8] sm:$0xff]  }
   0xc   :  { %v1713_v34 = vld [vmem:[%s2164_s0 + $0xf0] sm:$0xff]   ;;  %v1714_v35 = vld [vmem:[%s2164_s0 + $0xf8] sm:$0xff]  }
   0xe   :  { %1609 = vmatmul.mubr.msk.bf16.vlgmr.msra.gmra.mrb[0].mxu0 %vm258_vm0, %v1684_v5  ;;  %1641 = vmatmul.mubr.msk.bf16.vlgmr.msra.gmra.mrb[0].mxu1 %vm258_vm0, %v1700_v10 }
   0xf   :  { %1612 = vmatprep.mubr.msk.bf16.mxu0 %vm258_vm0, %v1685_v6  ;;  %1644 = vmatprep.mubr.msk.bf16.mxu1 %vm258_vm0, %v1701_v11 }
  0x16   :  { %1613 = vmatmul.mubr.msk.bf16.gmra.mrb[4].mxu0 %vm258_vm0, %v1686_v7  ;;  %1645 = vmatmul.mubr.msk.bf16.gmra.mrb[4].mxu1 %vm258_vm0, %v1702_v14 }
  0x17   :  { %1616 = vmatprep.mubr.msk.bf16.mxu0 %vm258_vm0, %v1687_v8  ;;  %1648 = vmatprep.mubr.msk.bf16.mxu1 %vm258_vm0, %v1703_v15 }
  0x1e   :  { %1617 = vmatmul.mubr.msk.bf16.gmra.mrb[8].mxu0 %vm258_vm0, %v1688_v12  ;;  %1649 = vmatmul.mubr.msk.bf16.gmra.mrb[8].mxu1 %vm258_vm0, %v1704_v17 }
  0x1f   :  { %1620 = vmatprep.mubr.msk.bf16.mxu0 %vm258_vm0, %v1689_v13  ;;  %1652 = vmatprep.mubr.msk.bf16.mxu1 %vm258_vm0, %v1705_v19 }
  0x26   :  { %1621 = vmatmul.mubr.msk.bf16.gmra.mrb[12].mxu0 %vm258_vm0, %v1690_v16  ;;  %1653 = vmatmul.mubr.msk.bf16.gmra.mrb[12].mxu1 %vm258_vm0, %v1706_v21 }
  0x27   :  { %1624 = vmatprep.mubr.msk.bf16.mxu0 %vm258_vm0, %v1691_v18  ;;  %1656 = vmatprep.mubr.msk.bf16.mxu1 %vm258_vm0, %v1707_v23 }
  0x2e   :  { %1625 = vmatmul.mubr.msk.bf16.gmra.mrb[16].mxu0 %vm258_vm0, %v1692_v20  ;;  %1657 = vmatmul.mubr.msk.bf16.gmra.mrb[16].mxu1 %vm258_vm0, %v1708_v25 }
  0x2f   :  { %1628 = vmatprep.mubr.msk.bf16.mxu0 %vm258_vm0, %v1693_v22  ;;  %1660 = vmatprep.mubr.msk.bf16.mxu1 %vm258_vm0, %v1709_v27 }
  0x36   :  { %1629 = vmatmul.mubr.msk.bf16.gmra.mrb[20].mxu0 %vm258_vm0, %v1694_v24  ;;  %1661 = vmatmul.mubr.msk.bf16.gmra.mrb[20].mxu1 %vm258_vm0, %v1710_v29 }
  0x37   :  { %1632 = vmatprep.mubr.msk.bf16.mxu0 %vm258_vm0, %v1695_v26  ;;  %1664 = vmatprep.mubr.msk.bf16.mxu1 %vm258_vm0, %v1711_v31 }
  0x3e   :  { %1633 = vmatmul.mubr.msk.bf16.gmra.mrb[24].mxu0 %vm258_vm0, %v1696_v28  ;;  %1665 = vmatmul.mubr.msk.bf16.gmra.mrb[24].mxu1 %vm258_vm0, %v1712_v33 }
  0x3f   :  { %1636 = vmatprep.mubr.msk.bf16.mxu0 %vm258_vm0, %v1697_v30  ;;  %1668 = vmatprep.mubr.msk.bf16.mxu1 %vm258_vm0, %v1713_v34 }
  0x46   :  { %1637 = vmatmul.mubr.msk.bf16.gmra.mrb[28].mxu0 %vm258_vm0, %v1698_v32  ;;  %1669 = vmatmul.mubr.msk.bf16.gmra.mrb[28].mxu1 %vm258_vm0, %v1714_v35 }
  0xe1   :  { %v1610_v36 = vpop.f32.mrb[0].mxu0  ;;  %v1878_v52 = vpop.f32.mrb[0].mxu1 }
  0xe2   :  { %v393_v37 = vpop.f32.mrb[1].mxu0  ;;  %v1039_v45 = vmul.f32 %v1610_v36, %v1610_v36  ;;  %v1880_v54 = vpop.f32.mrb[1].mxu1 }
  0xe3   :  { %v1611_v38 = vpop.f32.mrb[2].mxu0  ;;  %v1037_v41 = vmul.f32 %v393_v37, %v393_v37  ;;  %v1882_v59 = vpop.f32.mrb[2].mxu1 }
  0xe4   :  { %v1384_v39 = vpack.c.bf16 %v1611_v38, %v1610_v36  ;;  %v396_v40 = vpop.f32.mrb[3].mxu0  ;;  %v1040_v48 = vmul.f32 %v1611_v38, %v1611_v38  ;;  %v1464_v62 = vpack.c.bf16 %v1882_v59, %v1878_v52  ;;  %v1886_v63 = vpop.f32.mrb[3].mxu1 }
  0xe5   :  { %v1379_v42 = vpack.c.bf16 %v396_v40, %v393_v37  ;;  %v968_v43 = vadd.f32 %v396_v40, %v393_v37  ;;  %v1038_v44 = vmul.f32 %v396_v40, %v396_v40  ;;  %v1459_v4 = vpack.c.bf16 %v1886_v63, %v1880_v54 }
  0xe6   :  { %1536 = vst [vmem:[%s2165_s2 + $0x8] sm:$0xff] %v1384_v39   ;;  %1552 = vst [vmem:[%s2165_s2 + $0x88] sm:$0xff] %v1464_v62  }
  0xe7   :  { %1380 = vst [vmem:[%s2165_s2] sm:$0xff] %v1379_v42   ;;  %v969_v46 = vadd.f32 %v1610_v36, %v968_v43  ;;  %v1101_v47 = vadd.f32 %v1038_v44, %v1037_v41  ;;  %1551 = vst [vmem:[%s2165_s2 + $0x80] sm:$0xff] %v1459_v4  }
  0xe9   :  { %v1102_v49 = vadd.f32 %v1101_v47, %v1039_v45  ;;  %v1614_v50 = vpop.f32.mrb[4].mxu0  ;;  %v970_v51 = vadd.f32 %v1611_v38, %v969_v46  ;;  %v1902_v12 = vpop.f32.mrb[4].mxu1 }
  0xea   :  { %v409_v53 = vpop.f32.mrb[5].mxu0  ;;  %v1043_v5 = vmul.f32 %v1614_v50, %v1614_v50  ;;  %v1904_v14 = vpop.f32.mrb[5].mxu1 }
  0xeb   :  { %v971_v55 = vadd.f32 %v970_v51, %v409_v53  ;;  %v1041_v56 = vmul.f32 %v409_v53, %v409_v53  ;;  %v1103_v57 = vadd.f32 %v1102_v49, %v1040_v48  ;;  %v1615_v58 = vpop.f32.mrb[6].mxu0  ;;  %v1906_v19 = vpop.f32.mrb[6].mxu1 }
  0xec   :  { %v1394_v60 = vpack.c.bf16 %v1615_v58, %v1614_v50  ;;  %v412_v61 = vpop.f32.mrb[7].mxu0  ;;  %v1044_v8 = vmul.f32 %v1615_v58, %v1615_v58  ;;  %v1474_v22 = vpack.c.bf16 %v1906_v19, %v1902_v12  ;;  %v1910_v23 = vpop.f32.mrb[7].mxu1 }
  0xed   :  { %v1104_v0 = vadd.f32 %v1103_v57, %v1041_v56  ;;  %v1389_v1 = vpack.c.bf16 %v412_v61, %v409_v53  ;;  %v972_v2 = vadd.f32 %v971_v55, %v412_v61  ;;  %v1042_v3 = vmul.f32 %v412_v61, %v412_v61 }
  0xee   :  { %1538 = vst [vmem:[%s2165_s2 + $0x18] sm:$0xff] %v1394_v60   ;;  %1554 = vst [vmem:[%s2165_s2 + $0x98] sm:$0xff] %v1474_v22   ;;  %v1469_v28 = vpack.c.bf16 %v1910_v23, %v1904_v14 }
  0xef   :  { %1537 = vst [vmem:[%s2165_s2 + $0x10] sm:$0xff] %v1389_v1   ;;  %v973_v6 = vadd.f32 %v1614_v50, %v972_v2  ;;  %v1105_v7 = vadd.f32 %v1104_v0, %v1042_v3 }
  0xf0   :  { %1553 = vst [vmem:[%s2165_s2 + $0x90] sm:$0xff] %v1469_v28  }
  0xf1   :  { %v1106_v9 = vadd.f32 %v1105_v7, %v1043_v5  ;;  %v1618_v10 = vpop.f32.mrb[8].mxu0  ;;  %v974_v11 = vadd.f32 %v1615_v58, %v973_v6  ;;  %v1926_v36 = vpop.f32.mrb[8].mxu1 }
  0xf2   :  { %v425_v13 = vpop.f32.mrb[9].mxu0  ;;  %v1047_v29 = vmul.f32 %v1618_v10, %v1618_v10  ;;  %v1928_v38 = vpop.f32.mrb[9].mxu1 }
  0xf3   :  { %v975_v15 = vadd.f32 %v974_v11, %v425_v13  ;;  %v1045_v16 = vmul.f32 %v425_v13, %v425_v13  ;;  %v1107_v17 = vadd.f32 %v1106_v9, %v1044_v8  ;;  %v1619_v18 = vpop.f32.mrb[10].mxu0  ;;  %v1930_v43 = vpop.f32.mrb[10].mxu1 }
  0xf4   :  { %v1404_v20 = vpack.c.bf16 %v1619_v18, %v1618_v10  ;;  %v428_v21 = vpop.f32.mrb[11].mxu0  ;;  %v1048_v32 = vmul.f32 %v1619_v18, %v1619_v18  ;;  %v1484_v46 = vpack.c.bf16 %v1930_v43, %v1926_v36  ;;  %v1934_v47 = vpop.f32.mrb[11].mxu1 }
  0xf5   :  { %v1108_v24 = vadd.f32 %v1107_v17, %v1045_v16  ;;  %v1399_v25 = vpack.c.bf16 %v428_v21, %v425_v13  ;;  %v976_v26 = vadd.f32 %v975_v15, %v428_v21  ;;  %v1046_v27 = vmul.f32 %v428_v21, %v428_v21 }
  0xf6   :  { %1540 = vst [vmem:[%s2165_s2 + $0x28] sm:$0xff] %v1404_v20   ;;  %1556 = vst [vmem:[%s2165_s2 + $0xa8] sm:$0xff] %v1484_v46   ;;  %v1479_v53 = vpack.c.bf16 %v1934_v47, %v1928_v38 }
  0xf7   :  { %1539 = vst [vmem:[%s2165_s2 + $0x20] sm:$0xff] %v1399_v25   ;;  %v977_v30 = vadd.f32 %v1618_v10, %v976_v26  ;;  %v1109_v31 = vadd.f32 %v1108_v24, %v1046_v27 }
  0xf8   :  { %1555 = vst [vmem:[%s2165_s2 + $0xa0] sm:$0xff] %v1479_v53  }
  0xf9   :  { %v1110_v33 = vadd.f32 %v1109_v31, %v1047_v29  ;;  %v1622_v34 = vpop.f32.mrb[12].mxu0  ;;  %v978_v35 = vadd.f32 %v1619_v18, %v977_v30  ;;  %v1950_v0 = vpop.f32.mrb[12].mxu1 }
  0xfa   :  { %v441_v37 = vpop.f32.mrb[13].mxu0  ;;  %v1051_v55 = vmul.f32 %v1622_v34, %v1622_v34  ;;  %v1952_v2 = vpop.f32.mrb[13].mxu1 }
  0xfb   :  { %v979_v39 = vadd.f32 %v978_v35, %v441_v37  ;;  %v1049_v40 = vmul.f32 %v441_v37, %v441_v37  ;;  %v1111_v41 = vadd.f32 %v1110_v33, %v1048_v32  ;;  %v1623_v42 = vpop.f32.mrb[14].mxu0  ;;  %v1954_v7 = vpop.f32.mrb[14].mxu1 }
  0xfc   :  { %v1414_v44 = vpack.c.bf16 %v1623_v42, %v1622_v34  ;;  %v444_v45 = vpop.f32.mrb[15].mxu0  ;;  %v1052_v58 = vmul.f32 %v1623_v42, %v1623_v42  ;;  %v1494_v10 = vpack.c.bf16 %v1954_v7, %v1950_v0  ;;  %v1958_v11 = vpop.f32.mrb[15].mxu1 }
  0xfd   :  { %v1112_v48 = vadd.f32 %v1111_v41, %v1049_v40  ;;  %v1409_v49 = vpack.c.bf16 %v444_v45, %v441_v37  ;;  %v980_v50 = vadd.f32 %v979_v39, %v444_v45  ;;  %v1050_v51 = vmul.f32 %v444_v45, %v444_v45 }
  0xfe   :  { %1542 = vst [vmem:[%s2165_s2 + $0x38] sm:$0xff] %v1414_v44   ;;  %1558 = vst [vmem:[%s2165_s2 + $0xb8] sm:$0xff] %v1494_v10   ;;  %v1489_v18 = vpack.c.bf16 %v1958_v11, %v1952_v2 }
  0xff   :  { %1541 = vst [vmem:[%s2165_s2 + $0x30] sm:$0xff] %v1409_v49   ;;  %v981_v56 = vadd.f32 %v1622_v34, %v980_v50  ;;  %v1113_v57 = vadd.f32 %v1112_v48, %v1050_v51 }
 0x100   :  { %1557 = vst [vmem:[%s2165_s2 + $0xb0] sm:$0xff] %v1489_v18  }
 0x101   :  { %v1114_v60 = vadd.f32 %v1113_v57, %v1051_v55  ;;  %v1626_v61 = vpop.f32.mrb[16].mxu0  ;;  %v982_v62 = vadd.f32 %v1623_v42, %v981_v56  ;;  %v1974_v28 = vpop.f32.mrb[16].mxu1 }
 0x102   :  { %v457_v1 = vpop.f32.mrb[17].mxu0  ;;  %v1055_v20 = vmul.f32 %v1626_v61, %v1626_v61  ;;  %v1976_v30 = vpop.f32.mrb[17].mxu1 }
 0x103   :  { %v983_v3 = vadd.f32 %v982_v62, %v457_v1  ;;  %v1053_v4 = vmul.f32 %v457_v1, %v457_v1  ;;  %v1115_v5 = vadd.f32 %v1114_v60, %v1052_v58  ;;  %v1627_v6 = vpop.f32.mrb[18].mxu0  ;;  %v1978_v35 = vpop.f32.mrb[18].mxu1 }
 0x104   :  { %v1424_v8 = vpack.c.bf16 %v1627_v6, %v1626_v61  ;;  %v460_v9 = vpop.f32.mrb[19].mxu0  ;;  %v1056_v24 = vmul.f32 %v1627_v6, %v1627_v6  ;;  %v1504_v40 = vpack.c.bf16 %v1978_v35, %v1974_v28  ;;  %v1982_v41 = vpop.f32.mrb[19].mxu1 }
 0x105   :  { %v1116_v13 = vadd.f32 %v1115_v5, %v1053_v4  ;;  %v1419_v15 = vpack.c.bf16 %v460_v9, %v457_v1  ;;  %v984_v16 = vadd.f32 %v983_v3, %v460_v9  ;;  %v1054_v17 = vmul.f32 %v460_v9, %v460_v9 }
 0x106   :  { %1544 = vst [vmem:[%s2165_s2 + $0x48] sm:$0xff] %v1424_v8   ;;  %1560 = vst [vmem:[%s2165_s2 + $0xc8] sm:$0xff] %v1504_v40   ;;  %v1499_v48 = vpack.c.bf16 %v1982_v41, %v1976_v30 }
 0x107   :  { %1543 = vst [vmem:[%s2165_s2 + $0x40] sm:$0xff] %v1419_v15   ;;  %v985_v21 = vadd.f32 %v1626_v61, %v984_v16  ;;  %v1117_v22 = vadd.f32 %v1116_v13, %v1054_v17 }
 0x108   :  { %1559 = vst [vmem:[%s2165_s2 + $0xc0] sm:$0xff] %v1499_v48  }
 0x109   :  { %v1118_v25 = vadd.f32 %v1117_v22, %v1055_v20  ;;  %v1630_v26 = vpop.f32.mrb[20].mxu0  ;;  %v986_v27 = vadd.f32 %v1627_v6, %v985_v21  ;;  %v1998_v58 = vpop.f32.mrb[20].mxu1 }
 0x10a   :  { %v473_v29 = vpop.f32.mrb[21].mxu0  ;;  %v1059_v49 = vmul.f32 %v1630_v26, %v1630_v26  ;;  %v2000_v61 = vpop.f32.mrb[21].mxu1 }
 0x10b   :  { %v987_v31 = vadd.f32 %v986_v27, %v473_v29  ;;  %v1057_v32 = vmul.f32 %v473_v29, %v473_v29  ;;  %v1119_v33 = vadd.f32 %v1118_v25, %v1056_v24  ;;  %v1631_v34 = vpop.f32.mrb[22].mxu0  ;;  %v2002_v5 = vpop.f32.mrb[22].mxu1 }
 0x10c   :  { %v1434_v37 = vpack.c.bf16 %v1631_v34, %v1630_v26  ;;  %v476_v39 = vpop.f32.mrb[23].mxu0  ;;  %v1060_v53 = vmul.f32 %v1631_v34, %v1631_v34  ;;  %v1514_v9 = vpack.c.bf16 %v2002_v5, %v1998_v58  ;;  %v2006_v10 = vpop.f32.mrb[23].mxu1 }
 0x10d   :  { %v1120_v42 = vadd.f32 %v1119_v33, %v1057_v32  ;;  %v1429_v44 = vpack.c.bf16 %v476_v39, %v473_v29  ;;  %v988_v45 = vadd.f32 %v987_v31, %v476_v39  ;;  %v1058_v46 = vmul.f32 %v476_v39, %v476_v39 }
 0x10e   :  { %1546 = vst [vmem:[%s2165_s2 + $0x58] sm:$0xff] %v1434_v37   ;;  %1562 = vst [vmem:[%s2165_s2 + $0xd8] sm:$0xff] %v1514_v9   ;;  %v1509_v18 = vpack.c.bf16 %v2006_v10, %v2000_v61 }
 0x10f   :  { %1545 = vst [vmem:[%s2165_s2 + $0x50] sm:$0xff] %v1429_v44   ;;  %v989_v50 = vadd.f32 %v1630_v26, %v988_v45  ;;  %v1121_v51 = vadd.f32 %v1120_v42, %v1058_v46 }
 0x110   :  { %1561 = vst [vmem:[%s2165_s2 + $0xd0] sm:$0xff] %v1509_v18  }
 0x111   :  { %v1122_v55 = vadd.f32 %v1121_v51, %v1059_v49  ;;  %v1634_v56 = vpop.f32.mrb[24].mxu0  ;;  %v990_v57 = vadd.f32 %v1631_v34, %v989_v50  ;;  %v2022_v29 = vpop.f32.mrb[24].mxu1 }
 0x112   :  { %v489_v60 = vpop.f32.mrb[25].mxu0  ;;  %v1063_v20 = vmul.f32 %v1634_v56, %v1634_v56  ;;  %v2024_v32 = vpop.f32.mrb[25].mxu1 }
 0x113   :  { %v991_v62 = vadd.f32 %v990_v57, %v489_v60  ;;  %v1061_v1 = vmul.f32 %v489_v60, %v489_v60  ;;  %v1123_v3 = vadd.f32 %v1122_v55, %v1060_v53  ;;  %v1635_v4 = vpop.f32.mrb[26].mxu0  ;;  %v2026_v40 = vpop.f32.mrb[26].mxu1 }
 0x114   :  { %v1444_v6 = vpack.c.bf16 %v1635_v4, %v1634_v56  ;;  %v492_v8 = vpop.f32.mrb[27].mxu0  ;;  %v1064_v24 = vmul.f32 %v1635_v4, %v1635_v4  ;;  %v1524_v45 = vpack.c.bf16 %v2026_v40, %v2022_v29  ;;  %v2030_v46 = vpop.f32.mrb[27].mxu1 }
 0x115   :  { %v1124_v13 = vadd.f32 %v1123_v3, %v1061_v1  ;;  %v1439_v15 = vpack.c.bf16 %v492_v8, %v489_v60  ;;  %v992_v16 = vadd.f32 %v991_v62, %v492_v8  ;;  %v1062_v17 = vmul.f32 %v492_v8, %v492_v8 }
 0x116   :  { %1548 = vst [vmem:[%s2165_s2 + $0x68] sm:$0xff] %v1444_v6   ;;  %1564 = vst [vmem:[%s2165_s2 + $0xe8] sm:$0xff] %v1524_v45   ;;  %v1519_v53 = vpack.c.bf16 %v2030_v46, %v2024_v32  ;;  %v1069_v3 = vmul.f32 %v1880_v54, %v1880_v54 }
 0x117   :  { %1547 = vst [vmem:[%s2165_s2 + $0x60] sm:$0xff] %v1439_v15   ;;  %v993_v21 = vadd.f32 %v1634_v56, %v992_v16  ;;  %v1125_v22 = vadd.f32 %v1124_v13, %v1062_v17 }
 0x118   :  { %1563 = vst [vmem:[%s2165_s2 + $0xe0] sm:$0xff] %v1519_v53   ;;  %v1078_v53 = vmul.f32 %v1934_v47, %v1934_v47 }
 0x119   :  { %v1126_v25 = vadd.f32 %v1125_v22, %v1063_v20  ;;  %v1638_v26 = vpop.f32.mrb[28].mxu0  ;;  %v994_v27 = vadd.f32 %v1635_v4, %v993_v21  ;;  %v2048_v4 = vpop.f32.mrb[28].mxu1  ;;  %v1070_v20 = vmul.f32 %v1886_v63, %v1886_v63 }
 0x11a   :  { %v505_v31 = vpop.f32.mrb[29].mxu0  ;;  %v1067_v55 = vmul.f32 %v1638_v26, %v1638_v26  ;;  %v2050_v6 = vpop.f32.mrb[29].mxu1 }
 0x11b   :  { %v995_v33 = vadd.f32 %v994_v27, %v505_v31  ;;  %v1065_v34 = vmul.f32 %v505_v31, %v505_v31  ;;  %v1127_v37 = vadd.f32 %v1126_v25, %v1064_v24  ;;  %v1639_v39 = vpop.f32.mrb[30].mxu0  ;;  %v2053_v13 = vpop.f32.mrb[30].mxu1  ;;  %v1073_v27 = vmul.f32 %v1904_v14, %v1904_v14 }
 0x11c   :  { %v1454_v42 = vpack.c.bf16 %v1639_v39, %v1638_v26  ;;  %v508_v44 = vpop.f32.mrb[31].mxu0  ;;  %v1068_v60 = vmul.f32 %v1639_v39, %v1639_v39  ;;  %v1534_v15 = vpack.c.bf16 %v2053_v13, %v2048_v4  ;;  %v2057_v16 = vpop.f32.mrb[31].mxu1 }
 0x11d   :  { %v1128_v48 = vadd.f32 %v1127_v37, %v1065_v34  ;;  %v1449_v49 = vpack.c.bf16 %v508_v44, %v505_v31  ;;  %v996_v50 = vadd.f32 %v995_v33, %v508_v44  ;;  %v1066_v51 = vmul.f32 %v508_v44, %v508_v44 }
 0x11e   :  { %1550 = vst [vmem:[%s2165_s2 + $0x78] sm:$0xff] %v1454_v42   ;;  %v1529_v21 = vpack.c.bf16 %v2057_v16, %v2050_v6  ;;  %1566 = vst [vmem:[%s2165_s2 + $0xf8] sm:$0xff] %v1534_v15   ;;  %v1074_v37 = vmul.f32 %v1910_v23, %v1910_v23 }
 0x11f   :  { %1549 = vst [vmem:[%s2165_s2 + $0x70] sm:$0xff] %v1449_v49   ;;  %v997_v56 = vadd.f32 %v1638_v26, %v996_v50  ;;  %v1129_v57 = vadd.f32 %v1128_v48, %v1066_v51 }
 0x120   :  { %1565 = vst [vmem:[%s2165_s2 + $0xf0] sm:$0xff] %v1529_v21  }
 0x121   :  { %v1130_v62 = vadd.f32 %v1129_v57, %v1067_v55  ;;  %v998_v1 = vadd.f32 %v1639_v39, %v997_v56  ;;  %v1075_v39 = vmul.f32 %v1902_v12, %v1902_v12 }
 0x123   :  { %v999_v8 = vadd.f32 %v998_v1, %v1880_v54  ;;  %v1131_v9 = vadd.f32 %v1130_v62, %v1068_v60  ;;  %v1071_v54 = vmul.f32 %v1878_v52, %v1878_v52 }
 0x125   :  { %v1132_v17 = vadd.f32 %v1131_v9, %v1069_v3  ;;  %v1000_v18 = vadd.f32 %v999_v8, %v1886_v63  ;;  %v1072_v63 = vmul.f32 %v1882_v59, %v1882_v59  ;;  %v1082_v8 = vmul.f32 %v1958_v11, %v1958_v11 }
 0x127   :  { %v1001_v22 = vadd.f32 %v1878_v52, %v1000_v18  ;;  %v1133_v24 = vadd.f32 %v1132_v17, %v1070_v20 }
 0x129   :  { %v1134_v25 = vadd.f32 %v1133_v24, %v1071_v54  ;;  %v1002_v26 = vadd.f32 %v1882_v59, %v1001_v22  ;;  %v1076_v59 = vmul.f32 %v1906_v19, %v1906_v19  ;;  %v1086_v22 = vmul.f32 %v1982_v41, %v1982_v41 }
 0x12b   :  { %v1003_v31 = vadd.f32 %v1002_v26, %v1904_v14  ;;  %v1135_v33 = vadd.f32 %v1134_v25, %v1072_v63  ;;  %v1077_v14 = vmul.f32 %v1928_v38, %v1928_v38 }
 0x12d   :  { %v1136_v34 = vadd.f32 %v1135_v33, %v1073_v27  ;;  %v1004_v52 = vadd.f32 %v1003_v31, %v1910_v23 }
 0x12f   :  { %v1005_v42 = vadd.f32 %v1902_v12, %v1004_v52  ;;  %v1137_v44 = vadd.f32 %v1136_v34, %v1074_v37  ;;  %v1079_v12 = vmul.f32 %v1926_v36, %v1926_v36  ;;  %v1090_v34 = vmul.f32 %v2006_v10, %v2006_v10 }
 0x131   :  { %v1138_v45 = vadd.f32 %v1137_v44, %v1075_v39  ;;  %v1006_v48 = vadd.f32 %v1906_v19, %v1005_v42  ;;  %v1080_v19 = vmul.f32 %v1930_v43, %v1930_v43 }
 0x133   :  { %v1007_v49 = vadd.f32 %v1006_v48, %v1928_v38  ;;  %v1139_v50 = vadd.f32 %v1138_v45, %v1076_v59  ;;  %v1081_v38 = vmul.f32 %v1952_v2, %v1952_v2  ;;  %v1094_v48 = vmul.f32 %v2030_v46, %v2030_v46 }
 0x135   :  { %v1140_v51 = vadd.f32 %v1139_v50, %v1077_v14  ;;  %v1008_v23 = vadd.f32 %v1007_v49, %v1934_v47 }
 0x137   :  { %v1009_v55 = vadd.f32 %v1926_v36, %v1008_v23  ;;  %v1141_v56 = vadd.f32 %v1140_v51, %v1078_v53  ;;  %v1083_v36 = vmul.f32 %v1950_v0, %v1950_v0 }
 0x139   :  { %v1142_v57 = vadd.f32 %v1141_v56, %v1079_v12  ;;  %v1010_v60 = vadd.f32 %v1930_v43, %v1009_v55  ;;  %v1084_v43 = vmul.f32 %v1954_v7, %v1954_v7  ;;  %v1098_v55 = vmul.f32 %v2057_v16, %v2057_v16 }
 0x13b   :  { %v1011_v62 = vadd.f32 %v1010_v60, %v1952_v2  ;;  %v1143_v1 = vadd.f32 %v1142_v57, %v1080_v19  ;;  %v1085_v2 = vmul.f32 %v1976_v30, %v1976_v30 }
 0x13d   :  { %v1144_v3 = vadd.f32 %v1143_v1, %v1081_v38  ;;  %v1012_v47 = vadd.f32 %v1011_v62, %v1958_v11 }
 0x13f   :  { %v1013_v9 = vadd.f32 %v1950_v0, %v1012_v47  ;;  %v1145_v15 = vadd.f32 %v1144_v3, %v1082_v8  ;;  %v1087_v0 = vmul.f32 %v1974_v28, %v1974_v28 }
 0x141   :  { %v1146_v17 = vadd.f32 %v1145_v15, %v1083_v36  ;;  %v1014_v18 = vadd.f32 %v1954_v7, %v1013_v9  ;;  %v1088_v7 = vmul.f32 %v1978_v35, %v1978_v35 }
 0x143   :  { %v1015_v20 = vadd.f32 %v1014_v18, %v1976_v30  ;;  %v1147_v21 = vadd.f32 %v1146_v17, %v1084_v43  ;;  %v1089_v30 = vmul.f32 %v2000_v61, %v2000_v61 }
 0x145   :  { %v1148_v54 = vadd.f32 %v1147_v21, %v1085_v2  ;;  %v1016_v11 = vadd.f32 %v1015_v20, %v1982_v41 }
 0x147   :  { %v1017_v24 = vadd.f32 %v1974_v28, %v1016_v11  ;;  %v1149_v63 = vadd.f32 %v1148_v54, %v1086_v22  ;;  %v1091_v28 = vmul.f32 %v1998_v58, %v1998_v58 }
 0x149   :  { %v1150_v25 = vadd.f32 %v1149_v63, %v1087_v0  ;;  %v1018_v26 = vadd.f32 %v1978_v35, %v1017_v24  ;;  %v1092_v35 = vmul.f32 %v2002_v5, %v2002_v5 }
 0x14b   :  { %v1019_v27 = vadd.f32 %v1018_v26, %v2000_v61  ;;  %v1151_v31 = vadd.f32 %v1150_v25, %v1088_v7  ;;  %v1093_v61 = vmul.f32 %v2024_v32, %v2024_v32 }
 0x14d   :  { %v1152_v33 = vadd.f32 %v1151_v31, %v1089_v30  ;;  %v1020_v41 = vadd.f32 %v1019_v27, %v2006_v10 }
 0x14f   :  { %v1021_v52 = vadd.f32 %v1998_v58, %v1020_v41  ;;  %v1153_v37 = vadd.f32 %v1152_v33, %v1090_v34  ;;  %v1095_v58 = vmul.f32 %v2022_v29, %v2022_v29 }
 0x151   :  { %v1154_v39 = vadd.f32 %v1153_v37, %v1091_v28  ;;  %v1022_v42 = vadd.f32 %v2002_v5, %v1021_v52  ;;  %v1096_v5 = vmul.f32 %v2026_v40, %v2026_v40 }
 0x153   :  { %v1023_v44 = vadd.f32 %v1022_v42, %v2024_v32  ;;  %v1155_v59 = vadd.f32 %v1154_v39, %v1092_v35  ;;  %v1097_v32 = vmul.f32 %v2050_v6, %v2050_v6 }
 0x155   :  { %v1156_v45 = vadd.f32 %v1155_v59, %v1093_v61  ;;  %v1024_v10 = vadd.f32 %v1023_v44, %v2030_v46 }
 0x157   :  { %v1025_v14 = vadd.f32 %v2022_v29, %v1024_v10  ;;  %v1157_v49 = vadd.f32 %v1156_v45, %v1094_v48  ;;  %v1099_v29 = vmul.f32 %v2048_v4, %v2048_v4 }
 0x159   :  { %v1158_v50 = vadd.f32 %v1157_v49, %v1095_v58  ;;  %v1026_v51 = vadd.f32 %v2026_v40, %v1025_v14  ;;  %v1100_v40 = vmul.f32 %v2053_v13, %v2053_v13 }
 0x15b   :  { %v1027_v23 = vadd.f32 %v1026_v51, %v2050_v6  ;;  %v1159_v53 = vadd.f32 %v1158_v50, %v1096_v5 }
 0x15d   :  { %v1160_v12 = vadd.f32 %v1159_v53, %v1097_v32  ;;  %v1028_v46 = vadd.f32 %v1027_v23, %v2057_v16 }
 0x15f   :  { %v1029_v56 = vadd.f32 %v2048_v4, %v1028_v46  ;;  %v1161_v19 = vadd.f32 %v1160_v12, %v1098_v55 }
 0x161   :  { %v1030_v57 = vadd.f32 %v2053_v13, %v1029_v56  ;;  %v1162_v60 = vadd.f32 %v1161_v19, %v1099_v29 }
 0x163   :  { %v1031_v6 = vrot.slane %v1030_v57, 4  ;;  %v1163_v38 = vadd.f32 %v1162_v60, %v1100_v40 }
 0x165   :  { %v1032_v62 = vadd.f32 %v1031_v6, %v1030_v57  ;;  %v1164_v1 = vrot.slane %v1163_v38, 4 }
 0x167   :  { %v1033_v3 = vrot.slane %v1032_v62, 2  ;;  %v1165_v47 = vadd.f32 %v1164_v1, %v1163_v38 }
 0x169   :  { %v1034_v8 = vadd.f32 %v1033_v3, %v1032_v62  ;;  %v1166_v16 = vrot.slane %v1165_v47, 2 }
 0x16b   :  { %v1035_v36 = vrot.slane %v1034_v8, 1  ;;  %v1167_v9 = vadd.f32 %v1166_v16, %v1165_v47 }
 0x16d   :  { %v1168_v15 = vrot.slane %v1167_v9, 1  ;;  %v1036_v4 = vadd.f32 %v1035_v36, %v1034_v8 }
 0x16f   :  { %v1169_v43 = vadd.f32 %v1168_v15, %v1167_v9 }
 0x171   :  { %v1171_v17 = vsel %vm1170_vm2, %v1036_v4, %v1169_v43 }
 0x172   :  { %1172 = vst [vmem:[%s2166_s3] sm:$0x3] %v1171_v17 }

// kernel: residual_block.3
= control target key start
LH: loop header
LB: loop body
LE: loop exit
PB: predicated region body
PF: predicated region fallthrough
CT: control target
= control target key end

     0   :  { %vm677_vm0 = vcmask 1041408   ;;  %vm580_vm1 = vcmask 31744   ;;  %s2150_s2 = inlined_call_operand.vmem [shape: bf16[4,128], index: 2, kind: input, shape index: {}]   ;;  %s2151_s1 = inlined_call_operand.vmem [shape: bf16[512,4], index: 1, kind: input, shape index: {}]   ;;  %s2152_s0 = inlined_call_operand.vmem [shape: bf16[512,128], index: 0, kind: input, shape index: {}]   ;;  %s2153_s3 = inlined_call_operand.vmem [shape: f32[1,128], index: 3, kind: input, shape index: {}]   ;;  %s2154_s4 = inlined_call_operand.vmem [shape: f32[1,128], index: 4, kind: input, shape index: {}]   ;;  %s2155_s5 = inlined_call_operand.vmem [shape: f32[8,512], index: 5, kind: output, shape index: {}]  }
   0x1   :  { %v419_v0 = vld [vmem:[%s2150_s2] sm:$0x3]  ;;  %v1563_v3 = vld [vmem:[%s2151_s1 + $0x8] sm:$0xff]   ;;  %v1564_v4 = vld [vmem:[%s2151_s1 + $0x10] sm:$0xff]  }
   0x2   :  { %1560 = vmatprep.subr.msk.bf16.mxu0 %vm677_vm0, %v419_v0  ;;  %v679_v1 = vsel %vm677_vm0, %v419_v0, 0  ;;  %v1562_v2 = vld [vmem:[%s2151_s1] sm:$0xff]   ;;  %1561 = vmatprep.subr.msk.bf16.mxu1 %vm677_vm0, %v419_v0  ;;  %v1565_v5 = vld [vmem:[%s2151_s1 + $0x18] sm:$0xff]   ;;  %v1567_v8 = vld [vmem:[%s2151_s1 + $0x28] sm:$0xff]  }
   0x3   :  { %1493 = vmatpush3.bf16.msra.mxu0 %v679_v1  ;;  %1559 = vmatpush3.bf16.msra.mxu1 %v679_v1  ;;  %v1566_v6 = vld [vmem:[%s2151_s1 + $0x20] sm:$0xff]   ;;  %v1577_v9 = vld [vmem:[%s2151_s1 + $0x88] sm:$0xff]   ;;  %v1578_v10 = vld [vmem:[%s2151_s1 + $0x90] sm:$0xff]  }
   0x4   :  { %1494 = vmatprep.mubr.msk.bf16.mxu0 %vm580_vm1, %v1562_v2  ;;  %v1575_v7 = vld [vmem:[%s2151_s1 + $0x80] sm:$0xff]   ;;  %v1568_v11 = vld [vmem:[%s2151_s1 + $0x30] sm:$0xff]   ;;  %v1579_v12 = vld [vmem:[%s2151_s1 + $0x98] sm:$0xff]  }
   0x5   :  { %1526 = vmatprep.mubr.msk.bf16.mxu1 %vm580_vm1, %v1575_v7  ;;  %v1581_v13 = vld [vmem:[%s2151_s1 + $0xa0] sm:$0xff]   ;;  %v1569_v14 = vld [vmem:[%s2151_s1 + $0x38] sm:$0xff]   ;;  %v1583_v16 = vld [vmem:[%s2151_s1 + $0xa8] sm:$0xff]  }
   0x6   :  { %1495 = vmatmul.mubr.msk.bf16.vlgmr.msra.gmra.mrb[0].mxu0 %vm580_vm1, %v1563_v3  ;;  %1527 = vmatmul.mubr.msk.bf16.vlgmr.msra.gmra.mrb[0].mxu1 %vm580_vm1, %v1577_v9  ;;  %v1570_v15 = vld [vmem:[%s2151_s1 + $0x40] sm:$0xff]   ;;  %v1584_v17 = vld [vmem:[%s2151_s1 + $0xb0] sm:$0xff]   ;;  %v1571_v18 = vld [vmem:[%s2151_s1 + $0x48] sm:$0xff]  }
   0x7   :  { %1498 = vmatprep.mubr.msk.bf16.mxu0 %vm580_vm1, %v1564_v4  ;;  %1530 = vmatprep.mubr.msk.bf16.mxu1 %vm580_vm1, %v1578_v10  ;;  %v1572_v19 = vld [vmem:[%s2151_s1 + $0x50] sm:$0xff]   ;;  %v1585_v20 = vld [vmem:[%s2151_s1 + $0xb8] sm:$0xff]   ;;  %v1586_v21 = vld [vmem:[%s2151_s1 + $0xc0] sm:$0xff]  }
   0x8   :  { %v1573_v22 = vld [vmem:[%s2151_s1 + $0x58] sm:$0xff]   ;;  %v1574_v23 = vld [vmem:[%s2151_s1 + $0x60] sm:$0xff]   ;;  %v1587_v24 = vld [vmem:[%s2151_s1 + $0xc8] sm:$0xff]  }
   0x9   :  { %v1588_v25 = vld [vmem:[%s2151_s1 + $0xd0] sm:$0xff]   ;;  %v1576_v26 = vld [vmem:[%s2151_s1 + $0x68] sm:$0xff]   ;;  %v1589_v28 = vld [vmem:[%s2151_s1 + $0xd8] sm:$0xff]  }
   0xa   :  { %v1580_v27 = vld [vmem:[%s2151_s1 + $0x70] sm:$0xff]   ;;  %v1590_v29 = vld [vmem:[%s2151_s1 + $0xe0] sm:$0xff]   ;;  %v1582_v30 = vld [vmem:[%s2151_s1 + $0x78] sm:$0xff]  }
   0xb   :  { %v1591_v31 = vld [vmem:[%s2151_s1 + $0xe8] sm:$0xff]   ;;  %v1592_v32 = vld [vmem:[%s2151_s1 + $0xf0] sm:$0xff]   ;;  %v1593_v33 = vld [vmem:[%s2151_s1 + $0xf8] sm:$0xff]  }
   0xc   :  { %v1301_v34 = vld [vmem:[%s2152_s0] sm:$0xff]   ;;  %v1428_v37 = vld [vmem:[%s2152_s0 + $0x8] sm:$0xff]   ;;  %v1429_v47 = vld [vmem:[%s2152_s0 + $0x10] sm:$0xff]  }
   0xd   :  { %v1302_v35 = vunpack.c.l.bf16 %v1301_v34  ;;  %v1763_v36 = vld [vmem:[%s2153_s3] ss:$0 sm:$0xff]  ;;  %v1303_v38 = vunpack.c.h.bf16 %v1301_v34  ;;  %v1306_v40 = vunpack.c.l.bf16 %v1428_v37  ;;  %v1307_v45 = vunpack.c.h.bf16 %v1428_v37  ;;  %v1430_v62 = vld [vmem:[%s2152_s0 + $0x18] sm:$0xff]  }
   0xe   :  { %1499 = vmatmul.mubr.msk.bf16.gmra.mrb[4].mxu0 %vm580_vm1, %v1565_v5  ;;  %1531 = vmatmul.mubr.msk.bf16.gmra.mrb[4].mxu1 %vm580_vm1, %v1579_v12  ;;  %v1772_v41 = vld [vmem:[%s2154_s4] ss:$0 sm:$0xff]  ;;  %v1310_v53 = vunpack.c.l.bf16 %v1429_v47  ;;  %v1311_v0 = vunpack.c.h.bf16 %v1429_v47  ;;  %v1314_v2 = vunpack.c.l.bf16 %v1430_v62 }
   0xf   :  { %1502 = vmatprep.mubr.msk.bf16.mxu0 %vm580_vm1, %v1566_v6  ;;  %1534 = vmatprep.mubr.msk.bf16.mxu1 %vm580_vm1, %v1581_v13  ;;  %v156_v39 = vmul.f32 %v1302_v35, %v1763_v36  ;;  %v157_v42 = vmul.f32 %v1303_v38, %v1763_v36  ;;  %v158_v44 = vmul.f32 %v1306_v40, %v1763_v36 }
  0x10   :  { %v159_v50 = vmul.f32 %v1307_v45, %v1763_v36  ;;  %v160_v63 = vmul.f32 %v1310_v53, %v1763_v36  ;;  %v161_v7 = vmul.f32 %v1311_v0, %v1763_v36  ;;  %v162_v10 = vmul.f32 %v1314_v2, %v1763_v36 }
  0x11   :  { %v227_v43 = vadd.f32 %v1772_v41, %v156_v39  ;;  %v228_v46 = vadd.f32 %v1772_v41, %v157_v42  ;;  %v229_v49 = vadd.f32 %v1772_v41, %v158_v44 }
  0x12   :  { %v230_v58 = vadd.f32 %v1772_v41, %v159_v50  ;;  %v231_v6 = vadd.f32 %v1772_v41, %v160_v63 }
  0x13   :  { %v291_v48 = vmax.f32 %v227_v43, 0.0  ;;  %v292_v52 = vmax.f32 %v228_v46, 0.0  ;;  %v293_v57 = vmax.f32 %v229_v49, 0.0  ;;  %v1436_v43 = vld [vmem:[%s2152_s0 + $0x48] sm:$0xff]  }
  0x14   :  { %v294_v1 = vmax.f32 %v230_v58, 0.0 }
  0x16   :  { %1503 = vmatmul.mubr.msk.bf16.gmra.mrb[8].mxu0 %vm580_vm1, %v1567_v8  ;;  %1535 = vmatmul.mubr.msk.bf16.gmra.mrb[8].mxu1 %vm580_vm1, %v1583_v16  ;;  %v232_v16 = vadd.f32 %v1772_v41, %v161_v7 }
  0x17   :  { %1506 = vmatprep.mubr.msk.bf16.mxu0 %vm580_vm1, %v1568_v11  ;;  %1538 = vmatprep.mubr.msk.bf16.mxu1 %vm580_vm1, %v1584_v17  ;;  %v1315_v11 = vunpack.c.h.bf16 %v1430_v62  ;;  %v1431_v17 = vld [vmem:[%s2152_s0 + $0x20] sm:$0xff]  }
  0x18   :  { %v1319_v42 = vunpack.c.h.bf16 %v1431_v17 }
  0x1e   :  { %1507 = vmatmul.mubr.msk.bf16.gmra.mrb[12].mxu0 %vm580_vm1, %v1569_v14  ;;  %1539 = vmatmul.mubr.msk.bf16.gmra.mrb[12].mxu1 %vm580_vm1, %v1585_v20  ;;  %v233_v20 = vadd.f32 %v1772_v41, %v162_v10 }
  0x1f   :  { %1510 = vmatprep.mubr.msk.bf16.mxu0 %vm580_vm1, %v1570_v15  ;;  %1542 = vmatprep.mubr.msk.bf16.mxu1 %vm580_vm1, %v1586_v21  ;;  %v295_v15 = vmax.f32 %v231_v6, 0.0  ;;  %v163_v21 = vmul.f32 %v1315_v11, %v1763_v36 }
  0x20   :  { %v297_v34 = vmax.f32 %v233_v20, 0.0 }
  0x21   :  { %v234_v35 = vadd.f32 %v1772_v41, %v163_v21 }
  0x23   :  { %v298_v49 = vmax.f32 %v234_v35, 0.0 }
  0x26   :  { %1511 = vmatmul.mubr.msk.bf16.gmra.mrb[16].mxu0 %vm580_vm1, %v1571_v18  ;;  %1543 = vmatmul.mubr.msk.bf16.gmra.mrb[16].mxu1 %vm580_vm1, %v1587_v24 }
  0x27   :  { %1514 = vmatprep.mubr.msk.bf16.mxu0 %vm580_vm1, %v1572_v19  ;;  %1546 = vmatprep.mubr.msk.bf16.mxu1 %vm580_vm1, %v1588_v25 }
  0x2e   :  { %1515 = vmatmul.mubr.msk.bf16.gmra.mrb[20].mxu0 %vm580_vm1, %v1573_v22  ;;  %1547 = vmatmul.mubr.msk.bf16.gmra.mrb[20].mxu1 %vm580_vm1, %v1589_v28  ;;  %v1318_v22 = vunpack.c.l.bf16 %v1431_v17 }
  0x2f   :  { %1518 = vmatprep.mubr.msk.bf16.mxu0 %vm580_vm1, %v1574_v23  ;;  %1550 = vmatprep.mubr.msk.bf16.mxu1 %vm580_vm1, %v1590_v29  ;;  %v1435_v23 = vld [vmem:[%s2152_s0 + $0x40] sm:$0xff]  }
  0x30   :  { %v164_v37 = vmul.f32 %v1318_v22, %v1763_v36  ;;  %v1335_v44 = vunpack.c.h.bf16 %v1435_v23 }
  0x32   :  { %v235_v50 = vadd.f32 %v1772_v41, %v164_v37 }
  0x34   :  { %v299_v0 = vmax.f32 %v235_v50, 0.0 }
  0x36   :  { %1519 = vmatmul.mubr.msk.bf16.gmra.mrb[24].mxu0 %vm580_vm1, %v1576_v26  ;;  %1551 = vmatmul.mubr.msk.bf16.gmra.mrb[24].mxu1 %vm580_vm1, %v1591_v31  ;;  %v1432_v31 = vld [vmem:[%s2152_s0 + $0x28] sm:$0xff]  }
  0x37   :  { %1522 = vmatprep.mubr.msk.bf16.mxu0 %vm580_vm1, %v1580_v27  ;;  %1554 = vmatprep.mubr.msk.bf16.mxu1 %vm580_vm1, %v1592_v32  ;;  %v296_v27 = vmax.f32 %v232_v16, 0.0  ;;  %v1322_v45 = vunpack.c.l.bf16 %v1432_v31 }
  0x3e   :  { %1523 = vmatmul.mubr.msk.bf16.gmra.mrb[28].mxu0 %vm580_vm1, %v1582_v30  ;;  %1555 = vmatmul.mubr.msk.bf16.gmra.mrb[28].mxu1 %vm580_vm1, %v1593_v33  ;;  %v1334_v33 = vunpack.c.l.bf16 %v1435_v23 }
  0x40   :  { %v172_v47 = vmul.f32 %v1334_v33, %v1763_v36 }
  0x42   :  { %v243_v63 = vadd.f32 %v1772_v41, %v172_v47 }
  0xd9   :  { %v1496_v51 = vpop.f32.mrb[0].mxu0  ;;  %v1797_v18 = vpop.f32.mrb[0].mxu1 }
  0xda   :  { %v715_v54 = vpop.f32.mrb[1].mxu0  ;;  %v972_v3 = vadd.f32 %v1496_v51, %v293_v57  ;;  %v1799_v19 = vpop.f32.mrb[1].mxu1  ;;  %v1338_v51 = vunpack.c.l.bf16 %v1436_v43  ;;  %v173_v57 = vmul.f32 %v1335_v44, %v1763_v36 }
  0xdb   :  { %v1497_v55 = vpop.f32.mrb[2].mxu0  ;;  %v970_v56 = vadd.f32 %v715_v54, %v291_v48  ;;  %v1806_v24 = vpop.f32.mrb[2].mxu1 }
  0xdc   :  { %v718_v59 = vpop.f32.mrb[3].mxu0  ;;  %v1036_v13 = vmax.f32 %v972_v3, 0.0  ;;  %v973_v14 = vadd.f32 %v1497_v55, %v294_v1  ;;  %v1810_v29 = vpop.f32.mrb[3].mxu1  ;;  %v165_v55 = vmul.f32 %v1319_v42, %v1763_v36  ;;  %v1433_v1 = vld [vmem:[%s2152_s0 + $0x30] sm:$0xff]   ;;  %v174_v3 = vmul.f32 %v1338_v51, %v1763_v36 }
  0xdd   :  { %v971_v60 = vadd.f32 %v718_v59, %v292_v52  ;;  %v1034_v61 = vmax.f32 %v970_v56, 0.0  ;;  %v166_v59 = vmul.f32 %v1322_v45, %v1763_v36  ;;  %v244_v10 = vadd.f32 %v1772_v41, %v173_v57 }
  0xde   :  { %v1037_v25 = vmax.f32 %v973_v14, 0.0  ;;  %v1326_v14 = vunpack.c.l.bf16 %v1433_v1  ;;  %v245_v20 = vadd.f32 %v1772_v41, %v174_v3 }
  0xdf   :  { %1098 = vxpose.xlu0.b32.start [1/16] (narrow) %v1034_v61, 8  ;;  %v1035_v4 = vmax.f32 %v971_v60, 0.0  ;;  %v1323_v61 = vunpack.c.h.bf16 %v1432_v31  ;;  %v237_v11 = vadd.f32 %v1772_v41, %v166_v59 }
  0xe0   :  { %v168_v37 = vmul.f32 %v1326_v14, %v1763_v36  ;;  %v309_v44 = vmax.f32 %v245_v20, 0.0 }
  0xe1   :  { %v1500_v5 = vpop.f32.mrb[4].mxu0  ;;  %v1824_v46 = vpop.f32.mrb[4].mxu1  ;;  %v301_v33 = vmax.f32 %v237_v11, 0.0 }
  0xe2   :  { %v731_v8 = vpop.f32.mrb[5].mxu0  ;;  %v1827_v48 = vpop.f32.mrb[5].mxu1  ;;  %v976_v53 = vadd.f32 %v1500_v5, %v297_v34  ;;  %v1437_v5 = vld [vmem:[%s2152_s0 + $0x50] sm:$0xff]  }
  0xe3   :  { %v1790_v9 = vpop.f32.mrb[6].mxu0  ;;  %1099 = vxpose.xlu0.b32.cont [2/16] (narrow) %v1035_v4, 8  ;;  %v974_v26 = vadd.f32 %v731_v8, %v295_v15  ;;  %v1830_v52 = vpop.f32.mrb[6].mxu1  ;;  %v1339_v4 = vunpack.c.h.bf16 %v1436_v43  ;;  %v236_v8 = vadd.f32 %v1772_v41, %v165_v55  ;;  %v307_v15 = vmax.f32 %v243_v63, 0.0  ;;  %v1438_v55 = vld [vmem:[%s2152_s0 + $0x58] sm:$0xff]  }
  0xe4   :  { %v734_v12 = vpop.f32.mrb[7].mxu0  ;;  %v1836_v58 = vpop.f32.mrb[7].mxu1  ;;  %v1040_v6 = vmax.f32 %v976_v53, 0.0  ;;  %v977_v7 = vadd.f32 %v1790_v9, %v298_v49  ;;  %v1342_v16 = vunpack.c.l.bf16 %v1437_v5  ;;  %v1327_v43 = vunpack.c.h.bf16 %v1433_v1 }
  0xe5   :  { %v1038_v39 = vmax.f32 %v974_v26, 0.0  ;;  %v975_v40 = vadd.f32 %v734_v12, %v296_v27  ;;  %v175_v9 = vmul.f32 %v1339_v4, %v1763_v36  ;;  %v308_v27 = vmax.f32 %v244_v10, 0.0 }
  0xe6   :  { %v1041_v22 = vmax.f32 %v977_v7, 0.0  ;;  %v176_v42 = vmul.f32 %v1342_v16, %v1763_v36  ;;  %v1343_v49 = vunpack.c.h.bf16 %v1437_v5  ;;  %v239_v63 = vadd.f32 %v1772_v41, %v168_v37 }
  0xe7   :  { %1100 = vxpose.xlu0.b32.cont [3/16] (narrow) %v1036_v13, 8  ;;  %v1039_v54 = vmax.f32 %v975_v40, 0.0  ;;  %v167_v13 = vmul.f32 %v1323_v61, %v1763_v36  ;;  %v246_v45 = vadd.f32 %v1772_v41, %v175_v9  ;;  %v1346_v4 = vunpack.c.l.bf16 %v1438_v55 }
  0xe8   :  { %v177_v5 = vmul.f32 %v1343_v49, %v1763_v36 }
  0xe9   :  { %v1808_v28 = vpop.f32.mrb[8].mxu0  ;;  %v1857_v12 = vpop.f32.mrb[8].mxu1  ;;  %v238_v35 = vadd.f32 %v1772_v41, %v167_v13  ;;  %v310_v3 = vmax.f32 %v246_v45, 0.0 }
  0xea   :  { %v747_v30 = vpop.f32.mrb[9].mxu0  ;;  %v1860_v17 = vpop.f32.mrb[9].mxu1  ;;  %v980_v7 = vadd.f32 %v1808_v28, %v301_v33 }
  0xeb   :  { %v1815_v32 = vpop.f32.mrb[10].mxu0  ;;  %1101 = vxpose.xlu0.b32.cont [4/16] (narrow) %v1037_v25, 8  ;;  %v1864_v21 = vpop.f32.mrb[10].mxu1  ;;  %v978_v23 = vadd.f32 %v747_v30, %v299_v0  ;;  %v300_v25 = vmax.f32 %v236_v8, 0.0  ;;  %v1434_v30 = vld [vmem:[%s2152_s0 + $0x38] sm:$0xff]   ;;  %v302_v59 = vmax.f32 %v238_v35, 0.0  ;;  %v247_v0 = vadd.f32 %v1772_v41, %v176_v42 }
  0xec   :  { %v1819_v38 = vpop.f32.mrb[11].mxu0  ;;  %v1866_v31 = vpop.f32.mrb[11].mxu1  ;;  %v1330_v61 = vunpack.c.l.bf16 %v1434_v30  ;;  %v1443_v35 = vld [vmem:[%s2152_s0 + $0x80] sm:$0xff]   ;;  %v1044_v37 = vmax.f32 %v980_v7, 0.0 }
  0xed   :  { %v1042_v50 = vmax.f32 %v978_v23, 0.0  ;;  %v979_v51 = vadd.f32 %v1819_v38, %v300_v25  ;;  %v169_v38 = vmul.f32 %v1327_v43, %v1763_v36  ;;  %v311_v9 = vmax.f32 %v247_v0, 0.0 }
  0xee   :  { %v170_v20 = vmul.f32 %v1330_v61, %v1763_v36  ;;  %v303_v25 = vmax.f32 %v239_v63, 0.0 }
  0xef   :  { %1102 = vxpose.xlu0.b32.cont [5/16] (narrow) %v1038_v39, 8  ;;  %v1043_v8 = vmax.f32 %v979_v51, 0.0  ;;  %v240_v28 = vadd.f32 %v1772_v41, %v169_v38 }
  0xf1   :  { %v1833_v56 = vpop.f32.mrb[12].mxu0  ;;  %v1879_v57 = vpop.f32.mrb[12].mxu1 }
  0xf2   :  { %v1839_v60 = vpop.f32.mrb[13].mxu0  ;;  %v1883_v1 = vpop.f32.mrb[13].mxu1 }
  0xf3   :  { %v1841_v62 = vpop.f32.mrb[14].mxu0  ;;  %1103 = vxpose.xlu0.b32.cont [6/16] (narrow) %v1039_v54, 8 }
  0xf4   :  { %v1847_v2 = vpop.f32.mrb[15].mxu0 }
  0xf7   :  { %1104 = vxpose.xlu0.b32.cont [7/16] (narrow) %v1040_v6, 8  ;;  %v1887_v6 = vpop.f32.mrb[14].mxu1 }
  0xf8   :  { %v1892_v14 = vpop.f32.mrb[15].mxu1 }
  0xf9   :  { %v1512_v26 = vpop.f32.mrb[16].mxu0 }
  0xfa   :  { %v779_v34 = vpop.f32.mrb[17].mxu0  ;;  %v988_v10 = vadd.f32 %v1512_v26, %v309_v44  ;;  %v178_v26 = vmul.f32 %v1346_v4, %v1763_v36  ;;  %v1908_v44 = vpop.f32.mrb[16].mxu1 }
  0xfb   :  { %v1513_v39 = vpop.f32.mrb[18].mxu0  ;;  %1105 = vxpose.xlu0.b32.cont [8/16] (narrow) %v1041_v22, 8  ;;  %v986_v40 = vadd.f32 %v779_v34, %v307_v15  ;;  %v1331_v15 = vunpack.c.h.bf16 %v1434_v30  ;;  %v1347_v22 = vunpack.c.h.bf16 %v1438_v55  ;;  %v1439_v34 = vld [vmem:[%s2152_s0 + $0x60] sm:$0xff]   ;;  %v1911_v51 = vpop.f32.mrb[17].mxu1 }
  0xfc   :  { %v782_v47 = vpop.f32.mrb[19].mxu0  ;;  %v1052_v42 = vmax.f32 %v988_v10, 0.0  ;;  %v989_v30 = vadd.f32 %v1513_v39, %v310_v3  ;;  %v1350_v49 = vunpack.c.l.bf16 %v1439_v34  ;;  %v1915_v55 = vpop.f32.mrb[18].mxu1 }
  0xfd   :  { %v987_v53 = vadd.f32 %v782_v47, %v308_v27  ;;  %v1050_v54 = vmax.f32 %v986_v40, 0.0  ;;  %v248_v27 = vadd.f32 %v1772_v41, %v177_v5  ;;  %v981_v40 = vadd.f32 %v1815_v32, %v302_v59  ;;  %v1920_v38 = vpop.f32.mrb[19].mxu1 }
  0xfe   :  { %v171_v43 = vmul.f32 %v1331_v15, %v1763_v36  ;;  %v179_v47 = vmul.f32 %v1347_v22, %v1763_v36  ;;  %v249_v32 = vadd.f32 %v1772_v41, %v178_v26  ;;  %v982_v59 = vadd.f32 %v1839_v60, %v303_v25  ;;  %v1440_v26 = vld [vmem:[%s2152_s0 + $0x68] sm:$0xff]  }
  0xff   :  { %1130 = vxpose.xlu1.b32.start [1/16] (narrow) %v1050_v54, 8  ;;  %1106 = vxpose.xlu0.b32.cont [9/16] (narrow) %v1042_v50, 8  ;;  %v1051_v11 = vmax.f32 %v987_v53, 0.0  ;;  %v1366_v50 = vunpack.c.l.bf16 %v1443_v35  ;;  %v241_v53 = vadd.f32 %v1772_v41, %v170_v20  ;;  %v304_v54 = vmax.f32 %v240_v28, 0.0 }
 0x100   :  { %v1045_v39 = vmax.f32 %v981_v40, 0.0  ;;  %v1053_v61 = vmax.f32 %v989_v30, 0.0  ;;  %v312_v63 = vmax.f32 %v248_v27, 0.0  ;;  %v242_v3 = vadd.f32 %v1772_v41, %v171_v43  ;;  %v1444_v27 = vld [vmem:[%s2152_s0 + $0x88] sm:$0xff]  }
 0x101   :  { %v1890_v13 = vpop.f32.mrb[20].mxu0  ;;  %v250_v7 = vadd.f32 %v1772_v41, %v179_v47  ;;  %v188_v10 = vmul.f32 %v1366_v50, %v1763_v36  ;;  %v305_v60 = vmax.f32 %v241_v53, 0.0  ;;  %v1351_v15 = vunpack.c.h.bf16 %v1439_v34 }
 0x102   :  { %v795_v16 = vpop.f32.mrb[21].mxu0  ;;  %v1367_v20 = vunpack.c.h.bf16 %v1443_v35  ;;  %v983_v22 = vadd.f32 %v1847_v2, %v304_v54  ;;  %v313_v25 = vmax.f32 %v249_v32, 0.0  ;;  %v306_v40 = vmax.f32 %v242_v3, 0.0 }
 0x103   :  { %1131 = vxpose.xlu1.b32.cont [2/16] (narrow) %v1051_v11, 8  ;;  %1107 = vxpose.xlu0.b32.cont [10/16] (narrow) %v1043_v8, 8  ;;  %v1895_v23 = vpop.f32.mrb[22].mxu0  ;;  %v990_v45 = vadd.f32 %v795_v16, %v311_v9  ;;  %v180_v8 = vmul.f32 %v1350_v49, %v1763_v36  ;;  %v1046_v9 = vmax.f32 %v982_v59, 0.0  ;;  %v314_v34 = vmax.f32 %v250_v7, 0.0 }
 0x104   :  { %v798_v33 = vpop.f32.mrb[23].mxu0  ;;  %v259_v2 = vadd.f32 %v1772_v41, %v188_v10  ;;  %v1370_v30 = vunpack.c.l.bf16 %v1444_v27  ;;  %v181_v43 = vmul.f32 %v1351_v15, %v1763_v36  ;;  %v984_v49 = vadd.f32 %v1833_v56, %v305_v60  ;;  %v1441_v60 = vld [vmem:[%s2152_s0 + $0x70] sm:$0xff]  }
 0x105   :  { %v1054_v5 = vmax.f32 %v990_v45, 0.0  ;;  %v991_v28 = vadd.f32 %v798_v33, %v312_v63  ;;  %v251_v35 = vadd.f32 %v1772_v41, %v180_v8  ;;  %v1354_v33 = vunpack.c.l.bf16 %v1440_v26 }
 0x106   :  { %v189_v45 = vmul.f32 %v1367_v20, %v1763_v36  ;;  %v1047_v50 = vmax.f32 %v983_v22, 0.0  ;;  %v992_v53 = vadd.f32 %v1890_v13, %v313_v25  ;;  %v1355_v59 = vunpack.c.h.bf16 %v1440_v26 }
 0x107   :  { %1132 = vxpose.xlu1.b32.cont [3/16] (narrow) %v1052_v42, 8  ;;  %1108 = vxpose.xlu0.b32.cont [11/16] (narrow) %v1044_v37, 8  ;;  %v1937_v37 = vpop.f32.mrb[20].mxu1  ;;  %v1055_v54 = vmax.f32 %v991_v28, 0.0  ;;  %v315_v63 = vmax.f32 %v251_v35, 0.0  ;;  %v323_v3 = vmax.f32 %v259_v2, 0.0  ;;  %v182_v56 = vmul.f32 %v1354_v33, %v1763_v36 }
 0x108   :  { %v1941_v42 = vpop.f32.mrb[21].mxu1  ;;  %v190_v8 = vmul.f32 %v1370_v30, %v1763_v36  ;;  %v252_v13 = vadd.f32 %v1772_v41, %v181_v43  ;;  %v260_v10 = vadd.f32 %v1772_v41, %v189_v45  ;;  %v1048_v20 = vmax.f32 %v984_v49, 0.0  ;;  %v1445_v28 = vld [vmem:[%s2152_s0 + $0x90] sm:$0xff]  }
 0x109   :  { %v1918_v0 = vpop.f32.mrb[24].mxu0  ;;  %v1945_v47 = vpop.f32.mrb[22].mxu1  ;;  %v1056_v22 = vmax.f32 %v992_v53, 0.0  ;;  %v993_v25 = vadd.f32 %v1895_v23, %v314_v34  ;;  %v183_v26 = vmul.f32 %v1355_v59, %v1763_v36  ;;  %v1002_v2 = vadd.f32 %v1799_v19, %v323_v3 }
 0x10a   :  { %v811_v4 = vpop.f32.mrb[25].mxu0  ;;  %v1358_v33 = vunpack.c.l.bf16 %v1441_v60  ;;  %v261_v23 = vadd.f32 %v1772_v41, %v190_v8  ;;  %v1374_v34 = vunpack.c.l.bf16 %v1445_v28 }
 0x10b   :  { %1133 = vxpose.xlu1.b32.cont [4/16] (narrow) %v1053_v61, 8  ;;  %1109 = vxpose.xlu0.b32.cont [12/16] (narrow) %v1045_v39, 8  ;;  %v1926_v11 = vpop.f32.mrb[26].mxu0  ;;  %v1951_v39 = vpop.f32.mrb[23].mxu1  ;;  %v994_v35 = vadd.f32 %v811_v4, %v315_v63  ;;  %v1057_v49 = vmax.f32 %v993_v25, 0.0  ;;  %v324_v4 = vmax.f32 %v260_v10, 0.0  ;;  %v254_v19 = vadd.f32 %v1772_v41, %v183_v26 }
 0x10c   :  { %v1928_v16 = vpop.f32.mrb[27].mxu0  ;;  %v1066_v59 = vmax.f32 %v1002_v2, 0.0  ;;  %v1375_v63 = vunpack.c.h.bf16 %v1445_v28  ;;  %v184_v3 = vmul.f32 %v1358_v33, %v1763_v36  ;;  %v192_v8 = vmul.f32 %v1374_v34, %v1763_v36  ;;  %v1442_v25 = vld [vmem:[%s2152_s0 + $0x78] sm:$0xff]  }
 0x10d   :  { %v318_v26 = vmax.f32 %v254_v19, 0.0 }
 0x10e   :  { %v193_v2 = vmul.f32 %v1375_v63, %v1763_v36 }
 0x10f   :  { %1134 = vxpose.xlu1.b32.cont [5/16] (narrow) %v1054_v5, 8  ;;  %1110 = vxpose.xlu0.b32.cont [13/16] (narrow) %v1046_v9, 8  ;;  %v1371_v5 = vunpack.c.h.bf16 %v1444_v27  ;;  %v985_v9 = vadd.f32 %v1841_v62, %v306_v40  ;;  %v1972_v27 = vpop.f32.mrb[24].mxu1  ;;  %v253_v62 = vadd.f32 %v1772_v41, %v182_v56  ;;  %v1446_v56 = vld [vmem:[%s2152_s0 + $0x98] sm:$0xff]  }
 0x110   :  { %v1975_v30 = vpop.f32.mrb[25].mxu1 }
 0x111   :  { %v1949_v32 = vpop.f32.mrb[28].mxu0  ;;  %v191_v40 = vmul.f32 %v1371_v5, %v1763_v36  ;;  %v1980_v43 = vpop.f32.mrb[26].mxu1  ;;  %v1049_v45 = vmax.f32 %v985_v9, 0.0  ;;  %v317_v10 = vmax.f32 %v253_v62, 0.0 }
 0x112   :  { %v1953_v61 = vpop.f32.mrb[29].mxu0  ;;  %v1982_v53 = vpop.f32.mrb[27].mxu1 }
 0x113   :  { %1135 = vxpose.xlu1.b32.cont [6/16] (narrow) %v1055_v54, 8  ;;  %1111 = vxpose.xlu0.b32.cont [14/16] (narrow) %v1047_v50, 8  ;;  %v1955_v7 = vpop.f32.mrb[30].mxu0  ;;  %v316_v50 = vmax.f32 %v252_v13, 0.0  ;;  %v1058_v54 = vmax.f32 %v994_v35, 0.0  ;;  %v262_v5 = vadd.f32 %v1772_v41, %v191_v40  ;;  %v1359_v13 = vunpack.c.h.bf16 %v1441_v60  ;;  %v1996_v28 = vpop.f32.mrb[28].mxu1 }
 0x114   :  { %v1964_v15 = vpop.f32.mrb[31].mxu0  ;;  %v1378_v35 = vunpack.c.l.bf16 %v1446_v56  ;;  %v255_v60 = vadd.f32 %v1772_v41, %v184_v3  ;;  %v2000_v33 = vpop.f32.mrb[29].mxu1  ;;  %v996_v34 = vadd.f32 %v1918_v0, %v317_v10 }
 0x115   :  { %v995_v9 = vadd.f32 %v1928_v16, %v316_v50  ;;  %v326_v62 = vmax.f32 %v262_v5, 0.0  ;;  %v263_v16 = vadd.f32 %v1772_v41, %v192_v8  ;;  %v2004_v40 = vpop.f32.mrb[30].mxu1  ;;  %v1363_v8 = vunpack.c.h.bf16 %v1442_v25 }
 0x116   :  { %v194_v19 = vmul.f32 %v1378_v35, %v1763_v36  ;;  %v319_v63 = vmax.f32 %v255_v60, 0.0 }
 0x117   :  { %1136 = vxpose.xlu1.b32.cont [7/16] (narrow) %v1056_v22, 8  ;;  %1112 = vxpose.xlu0.b32.cont [15/16] (narrow) %v1048_v20, 8  ;;  %v325_v20 = vmax.f32 %v261_v23, 0.0  ;;  %v1003_v22 = vadd.f32 %v1810_v29, %v324_v4  ;;  %v1362_v29 = vunpack.c.l.bf16 %v1442_v25  ;;  %v185_v23 = vmul.f32 %v1359_v13, %v1763_v36  ;;  %v2008_v4 = vpop.f32.mrb[31].mxu1 }
 0x118   :  { %v327_v3 = vmax.f32 %v263_v16, 0.0  ;;  %v1060_v13 = vmax.f32 %v996_v34, 0.0  ;;  %v998_v35 = vadd.f32 %v1953_v61, %v319_v63 }
 0x119   :  { %v1067_v50 = vmax.f32 %v1003_v22, 0.0  ;;  %v186_v5 = vmul.f32 %v1362_v29, %v1763_v36  ;;  %v256_v0 = vadd.f32 %v1772_v41, %v185_v23  ;;  %v265_v22 = vadd.f32 %v1772_v41, %v194_v19  ;;  %v1448_v19 = vld [vmem:[%s2152_s0 + $0xa8] sm:$0xff]  }
 0x11b   :  { %1137 = vxpose.xlu1.b32.cont [8/16] (narrow) %v1057_v49, 8  ;;  %1113 = vxpose.xlu0.b32.end [16/16] (narrow) %v1049_v45, 8  ;;  %v1004_v45 = vadd.f32 %v1797_v18, %v325_v20  ;;  %v1059_v49 = vmax.f32 %v995_v9, 0.0  ;;  %v1451_v18 = vld [vmem:[%s2152_s0 + $0xc0] sm:$0xff]   ;;  %v997_v20 = vadd.f32 %v1926_v11, %v318_v26  ;;  %v257_v16 = vadd.f32 %v1772_v41, %v186_v5 }
 0x11c   :  { %v1447_v9 = vld [vmem:[%s2152_s0 + $0xa0] sm:$0xff]   ;;  %v187_v11 = vmul.f32 %v1363_v8, %v1763_v36  ;;  %v320_v23 = vmax.f32 %v256_v0, 0.0  ;;  %v1399_v63 = vunpack.c.h.bf16 %v1451_v18  ;;  %v1452_v0 = vld [vmem:[%s2152_s0 + $0xc8] sm:$0xff]  }
 0x11d   :  { %v1068_v10 = vmax.f32 %v1004_v45, 0.0  ;;  %v1382_v29 = vunpack.c.l.bf16 %v1447_v9  ;;  %v1062_v45 = vmax.f32 %v998_v35, 0.0  ;;  %v321_v5 = vmax.f32 %v257_v16, 0.0 }
 0x11e   :  { %v999_v8 = vadd.f32 %v1964_v15, %v320_v23  ;;  %v1387_v16 = vunpack.c.h.bf16 %v1448_v19 }
 0x11f   :  { %1138 = vxpose.xlu1.b32.cont [9/16] (narrow) %v1058_v54, 8  ;;  %1162 = vxpose.xlu0.b32.start [1/16] (narrow) %v1066_v59, 8  ;;  %v1379_v54 = vunpack.c.h.bf16 %v1446_v56  ;;  %v264_v59 = vadd.f32 %v1772_v41, %v193_v2  ;;  %v1005_v56 = vadd.f32 %v1806_v24, %v326_v62  ;;  %v1398_v2 = vunpack.c.l.bf16 %v1451_v18 }
 0x120   :  { %v1061_v24 = vmax.f32 %v997_v20, 0.0  ;;  %v1006_v62 = vadd.f32 %v1827_v48, %v327_v3  ;;  %v1000_v35 = vadd.f32 %v1949_v32, %v321_v5 }
 0x121   :  { %v195_v25 = vmul.f32 %v1379_v54, %v1763_v36  ;;  %v328_v60 = vmax.f32 %v264_v59, 0.0  ;;  %v1069_v26 = vmax.f32 %v1005_v56, 0.0  ;;  %v204_v61 = vmul.f32 %v1398_v2, %v1763_v36 }
 0x122   :  { %v196_v54 = vmul.f32 %v1382_v29, %v1763_v36  ;;  %v258_v59 = vadd.f32 %v1772_v41, %v187_v11  ;;  %v1070_v48 = vmax.f32 %v1006_v62, 0.0  ;;  %v1063_v2 = vmax.f32 %v999_v8, 0.0 }
 0x123   :  { %1139 = vxpose.xlu1.b32.cont [10/16] (narrow) %v1059_v49, 8  ;;  %1163 = vxpose.xlu0.b32.cont [2/16] (narrow) %v1067_v50, 8  ;;  %v266_v34 = vadd.f32 %v1772_v41, %v195_v25  ;;  %v1383_v49 = vunpack.c.h.bf16 %v1447_v9  ;;  %v329_v50 = vmax.f32 %v265_v22, 0.0  ;;  %v1007_v3 = vadd.f32 %v1836_v58, %v328_v60 }
 0x124   :  { %v275_v56 = vadd.f32 %v1772_v41, %v204_v61  ;;  %v267_v18 = vadd.f32 %v1772_v41, %v196_v54  ;;  %v322_v9 = vmax.f32 %v258_v59, 0.0  ;;  %v1402_v22 = vunpack.c.l.bf16 %v1452_v0  ;;  %v1449_v61 = vld [vmem:[%s2152_s0 + $0xb0] sm:$0xff]  }
 0x125   :  { %v197_v20 = vmul.f32 %v1383_v49, %v1763_v36  ;;  %v205_v58 = vmul.f32 %v1399_v63, %v1763_v36  ;;  %v1008_v15 = vadd.f32 %v1824_v46, %v329_v50  ;;  %v1071_v25 = vmax.f32 %v1007_v3, 0.0  ;;  %v1453_v46 = vld [vmem:[%s2152_s0 + $0xd0] sm:$0xff]  }
 0x126   :  { %v339_v11 = vmax.f32 %v275_v56, 0.0  ;;  %v1403_v62 = vunpack.c.h.bf16 %v1452_v0  ;;  %v1001_v49 = vadd.f32 %v1955_v7, %v322_v9  ;;  %v1406_v59 = vunpack.c.l.bf16 %v1453_v46 }
 0x127   :  { %1140 = vxpose.xlu1.b32.cont [11/16] (narrow) %v1060_v13, 8  ;;  %1164 = vxpose.xlu0.b32.cont [3/16] (narrow) %v1068_v10, 8  ;;  %v330_v13 = vmax.f32 %v266_v34, 0.0  ;;  %v1386_v10 = vunpack.c.l.bf16 %v1448_v19  ;;  %v268_v29 = vadd.f32 %v1772_v41, %v197_v20  ;;  %v276_v23 = vadd.f32 %v1772_v41, %v205_v58 }
 0x128   :  { %v1072_v32 = vmax.f32 %v1008_v15, 0.0  ;;  %v199_v19 = vmul.f32 %v1387_v16, %v1763_v36  ;;  %v1018_v54 = vadd.f32 %v1911_v51, %v339_v11  ;;  %v207_v3 = vmul.f32 %v1403_v62, %v1763_v36 }
 0x129   :  { %v198_v60 = vmul.f32 %v1386_v10, %v1763_v36  ;;  %v1009_v34 = vadd.f32 %v1830_v52, %v330_v13  ;;  %v332_v63 = vmax.f32 %v268_v29, 0.0  ;;  %v1065_v8 = vmax.f32 %v1001_v49, 0.0 }
 0x12a   :  { %v340_v0 = vmax.f32 %v276_v23, 0.0  ;;  %v270_v13 = vadd.f32 %v1772_v41, %v199_v19  ;;  %v1391_v10 = vunpack.c.h.bf16 %v1449_v61  ;;  %v1082_v20 = vmax.f32 %v1018_v54, 0.0 }
 0x12b   :  { %1141 = vxpose.xlu1.b32.cont [12/16] (narrow) %v1061_v24, 8  ;;  %1165 = vxpose.xlu0.b32.cont [4/16] (narrow) %v1069_v26, 8  ;;  %v331_v24 = vmax.f32 %v267_v18, 0.0  ;;  %v206_v26 = vmul.f32 %v1402_v22, %v1763_v36  ;;  %v269_v50 = vadd.f32 %v1772_v41, %v198_v60  ;;  %v1073_v7 = vmax.f32 %v1009_v34, 0.0  ;;  %v1450_v18 = vld [vmem:[%s2152_s0 + $0xb8] sm:$0xff]  }
 0x12c   :  { %v208_v51 = vmul.f32 %v1406_v59, %v1763_v36  ;;  %v278_v22 = vadd.f32 %v1772_v41, %v207_v3  ;;  %v1011_v15 = vadd.f32 %v1866_v31, %v332_v63  ;;  %v334_v60 = vmax.f32 %v270_v13, 0.0 }
 0x12d   :  { %v277_v52 = vadd.f32 %v1772_v41, %v206_v26  ;;  %v1010_v5 = vadd.f32 %v1860_v17, %v331_v24  ;;  %v333_v56 = vmax.f32 %v269_v50, 0.0  ;;  %v1407_v17 = vunpack.c.h.bf16 %v1453_v46 }
 0x12e   :  { %v1394_v16 = vunpack.c.l.bf16 %v1450_v18  ;;  %v201_v29 = vmul.f32 %v1391_v10, %v1763_v36  ;;  %v279_v11 = vadd.f32 %v1772_v41, %v208_v51  ;;  %v342_v26 = vmax.f32 %v278_v22, 0.0 }
 0x12f   :  { %1142 = vxpose.xlu1.b32.cont [13/16] (narrow) %v1062_v45, 8  ;;  %1166 = vxpose.xlu0.b32.cont [5/16] (narrow) %v1070_v48, 8  ;;  %v1064_v45 = vmax.f32 %v1000_v35, 0.0  ;;  %v1390_v48 = vunpack.c.l.bf16 %v1449_v61  ;;  %v1074_v58 = vmax.f32 %v1010_v5, 0.0  ;;  %v1019_v35 = vadd.f32 %v1920_v38, %v340_v0 }
 0x130   :  { %v209_v31 = vmul.f32 %v1407_v17, %v1763_v36  ;;  %v1012_v38 = vadd.f32 %v1857_v12, %v333_v56  ;;  %v1075_v23 = vmax.f32 %v1011_v15, 0.0  ;;  %v202_v34 = vmul.f32 %v1394_v16, %v1763_v36  ;;  %v1455_v12 = vld [vmem:[%s2152_s0 + $0xe0] sm:$0xff]  }
 0x131   :  { %v200_v9 = vmul.f32 %v1390_v48, %v1763_v36  ;;  %v272_v49 = vadd.f32 %v1772_v41, %v201_v29  ;;  %v343_v61 = vmax.f32 %v279_v11, 0.0  ;;  %v1013_v63 = vadd.f32 %v1864_v21, %v334_v60 }
 0x132   :  { %v280_v59 = vadd.f32 %v1772_v41, %v209_v31  ;;  %v1414_v5 = vunpack.c.l.bf16 %v1455_v12  ;;  %v1415_v17 = vunpack.c.h.bf16 %v1455_v12 }
 0x133   :  { %1143 = vxpose.xlu1.b32.cont [14/16] (narrow) %v1063_v2, 8  ;;  %1167 = vxpose.xlu0.b32.cont [6/16] (narrow) %v1071_v25, 8  ;;  %v341_v25 = vmax.f32 %v277_v52, 0.0  ;;  %v1454_v2 = vld [vmem:[%s2152_s0 + $0xd8] sm:$0xff]   ;;  %v271_v24 = vadd.f32 %v1772_v41, %v200_v9  ;;  %v1021_v52 = vadd.f32 %v1915_v55, %v342_v26  ;;  %v336_v0 = vmax.f32 %v272_v49, 0.0 }
 0x134   :  { %v1410_v62 = vunpack.c.l.bf16 %v1454_v2  ;;  %v1411_v54 = vunpack.c.h.bf16 %v1454_v2  ;;  %v344_v56 = vmax.f32 %v280_v59, 0.0  ;;  %v213_v11 = vmul.f32 %v1415_v17, %v1763_v36 }
 0x135   :  { %v1020_v46 = vadd.f32 %v1908_v44, %v341_v25  ;;  %v335_v50 = vmax.f32 %v271_v24, 0.0  ;;  %v1076_v44 = vmax.f32 %v1012_v38, 0.0  ;;  %v1085_v51 = vmax.f32 %v1021_v52, 0.0 }
 0x136   :  { %v210_v19 = vmul.f32 %v1410_v62, %v1763_v36  ;;  %v211_v10 = vmul.f32 %v1411_v54, %v1763_v36  ;;  %v1015_v15 = vadd.f32 %v1892_v14, %v336_v0 }
 0x137   :  { %1144 = vxpose.xlu1.b32.cont [15/16] (narrow) %v1064_v45, 8  ;;  %1168 = vxpose.xlu0.b32.cont [7/16] (narrow) %v1072_v32, 8  ;;  %v1083_v32 = vmax.f32 %v1019_v35, 0.0  ;;  %v1395_v45 = vunpack.c.h.bf16 %v1450_v18  ;;  %v1084_v48 = vmax.f32 %v1020_v46, 0.0  ;;  %v1014_v21 = vadd.f32 %v1883_v1, %v335_v50  ;;  %v1456_v1 = vld [vmem:[%s2152_s0 + $0xe8] sm:$0xff]   ;;  %v1457_v46 = vld [vmem:[%s2152_s0 + $0xf0] sm:$0xff]  }
 0x138   :  { %v281_v13 = vadd.f32 %v1772_v41, %v210_v19  ;;  %v282_v22 = vadd.f32 %v1772_v41, %v211_v10  ;;  %v1023_v35 = vadd.f32 %v1951_v39, %v344_v56  ;;  %v1418_v29 = vunpack.c.l.bf16 %v1456_v1 }
 0x139   :  { %v203_v3 = vmul.f32 %v1395_v45, %v1763_v36  ;;  %v1079_v26 = vmax.f32 %v1015_v15, 0.0  ;;  %v1419_v38 = vunpack.c.h.bf16 %v1456_v1  ;;  %v1422_v49 = vunpack.c.l.bf16 %v1457_v46 }
 0x13a   :  { %v345_v25 = vmax.f32 %v281_v13, 0.0  ;;  %v346_v16 = vmax.f32 %v282_v22, 0.0  ;;  %v1087_v62 = vmax.f32 %v1023_v35, 0.0  ;;  %v214_v31 = vmul.f32 %v1418_v29, %v1763_v36 }
 0x13b   :  { %1145 = vxpose.xlu1.b32.end [16/16] (narrow) %v1065_v8, 8  ;;  %1169 = vxpose.xlu0.b32.cont [8/16] (narrow) %v1073_v7, 8  ;;  %v1022_v7 = vadd.f32 %v1941_v42, %v343_v61  ;;  %v273_v8 = vadd.f32 %v1772_v41, %v202_v34  ;;  %v212_v42 = vmul.f32 %v1414_v5, %v1763_v36 }
 0x13c   :  { %v274_v9 = vadd.f32 %v1772_v41, %v203_v3  ;;  %v1024_v14 = vadd.f32 %v1937_v37, %v345_v25  ;;  %v1025_v45 = vadd.f32 %v1945_v47, %v346_v16  ;;  %v215_v61 = vmul.f32 %v1419_v38, %v1763_v36 }
 0x13d   :  { %v1086_v55 = vmax.f32 %v1022_v7, 0.0  ;;  %v337_v18 = vmax.f32 %v273_v8, 0.0  ;;  %v283_v2 = vadd.f32 %v1772_v41, %v212_v42  ;;  %v285_v54 = vadd.f32 %v1772_v41, %v214_v31 }
 0x13e   :  { %v338_v60 = vmax.f32 %v274_v9, 0.0  ;;  %v1089_v19 = vmax.f32 %v1025_v45, 0.0 }
 0x13f   :  { %1194 = vxpose.xlu1.b32.start [1/16] (narrow) %v1082_v20, 8  ;;  %1170 = vxpose.xlu0.b32.cont [9/16] (narrow) %v1074_v58, 8  ;;  %v1077_v20 = vmax.f32 %v1013_v63, 0.0  ;;  %v1078_v58 = vmax.f32 %v1014_v21, 0.0  ;;  %v1016_v24 = vadd.f32 %v1879_v57, %v337_v18  ;;  %v347_v39 = vmax.f32 %v283_v2, 0.0 }
 0x140   :  { %v1017_v34 = vadd.f32 %v1887_v6, %v338_v60  ;;  %v1088_v57 = vmax.f32 %v1024_v14, 0.0  ;;  %v216_v6 = vmul.f32 %v1422_v49, %v1763_v36  ;;  %v349_v47 = vmax.f32 %v285_v54, 0.0 }
 0x141   :  { %v1026_v37 = vadd.f32 %v1975_v30, %v347_v39  ;;  %v1423_v63 = vunpack.c.h.bf16 %v1457_v46 }
 0x142   :  { %v1081_v50 = vmax.f32 %v1017_v34, 0.0  ;;  %v287_v52 = vadd.f32 %v1772_v41, %v216_v6  ;;  %v1028_v36 = vadd.f32 %v1972_v27, %v349_v47 }
 0x143   :  { %1195 = vxpose.xlu1.b32.cont [2/16] (narrow) %v1083_v32, 8  ;;  %1171 = vxpose.xlu0.b32.cont [10/16] (narrow) %v1075_v23, 8  ;;  %v284_v23 = vadd.f32 %v1772_v41, %v213_v11  ;;  %v1080_v32 = vmax.f32 %v1016_v24, 0.0  ;;  %v1090_v12 = vmax.f32 %v1026_v37, 0.0 }
 0x144   :  { %v351_v13 = vmax.f32 %v287_v52, 0.0 }
 0x145   :  { %v348_v59 = vmax.f32 %v284_v23, 0.0 }
 0x146   :  { %v1030_v27 = vadd.f32 %v2000_v33, %v351_v13 }
 0x147   :  { %1196 = vxpose.xlu1.b32.cont [3/16] (narrow) %v1084_v48, 8  ;;  %1172 = vxpose.xlu0.b32.cont [11/16] (narrow) %v1076_v44, 8  ;;  %v286_v44 = vadd.f32 %v1772_v41, %v215_v61  ;;  %v1027_v30 = vadd.f32 %v1982_v53, %v348_v59  ;;  %v1458_v48 = vld [vmem:[%s2152_s0 + $0xf8] sm:$0xff]   ;;  %v1594_v53 = vld [vmem:[%s2153_s3] ss:$0 sm:$0xff] }
 0x148   :  { %v1426_v8 = vunpack.c.l.bf16 %v1458_v48  ;;  %v217_v0 = vmul.f32 %v1594_v53, %v1423_v63  ;;  %v1427_v10 = vunpack.c.h.bf16 %v1458_v48  ;;  %v1094_v22 = vmax.f32 %v1030_v27, 0.0 }
 0x149   :  { %v350_v7 = vmax.f32 %v286_v44, 0.0  ;;  %v1091_v5 = vmax.f32 %v1027_v30, 0.0 }
 0x14a   :  { %v218_v21 = vmul.f32 %v1594_v53, %v1426_v8  ;;  %v219_v18 = vmul.f32 %v1594_v53, %v1427_v10 }
 0x14b   :  { %1197 = vxpose.xlu1.b32.cont [4/16] (narrow) %v1085_v51, 8  ;;  %1173 = vxpose.xlu0.b32.cont [12/16] (narrow) %v1077_v20, 8  ;;  %v1092_v20 = vmax.f32 %v1028_v36, 0.0  ;;  %v1029_v41 = vadd.f32 %v1980_v43, %v350_v7  ;;  %v1595_v51 = vld [vmem:[%s2154_s4] ss:$0 sm:$0xff] }
 0x14c   :  { %v288_v56 = vadd.f32 %v1595_v51, %v217_v0  ;;  %v289_v42 = vadd.f32 %v1595_v51, %v218_v21 }
 0x14e   :  { %v352_v9 = vmax.f32 %v288_v56, 0.0  ;;  %v353_v17 = vmax.f32 %v289_v42, 0.0 }
 0x14f   :  { %1198 = vxpose.xlu1.b32.cont [5/16] (narrow) %v1086_v55, 8  ;;  %1174 = vxpose.xlu0.b32.cont [13/16] (narrow) %v1078_v58, 8  ;;  %v1093_v55 = vmax.f32 %v1029_v41, 0.0  ;;  %v290_v58 = vadd.f32 %v1595_v51, %v219_v18 }
 0x150   :  { %v1031_v15 = vadd.f32 %v2008_v4, %v352_v9  ;;  %v1032_v43 = vadd.f32 %v1996_v28, %v353_v17 }
 0x151   :  { %v354_v25 = vmax.f32 %v290_v58, 0.0 }
 0x152   :  { %v1095_v35 = vmax.f32 %v1031_v15, 0.0  ;;  %v1096_v1 = vmax.f32 %v1032_v43, 0.0 }
 0x153   :  { %1199 = vxpose.xlu1.b32.cont [6/16] (narrow) %v1087_v62, 8  ;;  %1175 = vxpose.xlu0.b32.cont [14/16] (narrow) %v1079_v26, 8  ;;  %v1033_v33 = vadd.f32 %v2004_v40, %v354_v25 }
 0x155   :  { %v1097_v2 = vmax.f32 %v1033_v33, 0.0 }
 0x157   :  { %1200 = vxpose.xlu1.b32.cont [7/16] (narrow) %v1088_v57, 8  ;;  %1176 = vxpose.xlu0.b32.cont [15/16] (narrow) %v1080_v32, 8 }
 0x15b   :  { %1201 = vxpose.xlu1.b32.cont [8/16] (narrow) %v1089_v19, 8  ;;  %1177 = vxpose.xlu0.b32.end [16/16] (narrow) %v1081_v50, 8 }
 0x15f   :  { %1202 = vxpose.xlu1.b32.cont [9/16] (narrow) %v1090_v12, 8  ;;  %v1114_v3 = vpop.trf.xlu0 }
 0x160   :  { %1226 = vst [vmem:[%s2155_s5] sm:$0xff] %v1114_v3 }
 0x163   :  { %1203 = vxpose.xlu1.b32.cont [10/16] (narrow) %v1091_v5, 8 }
 0x167   :  { %1204 = vxpose.xlu1.b32.cont [11/16] (narrow) %v1092_v20, 8 }
 0x16b   :  { %1205 = vxpose.xlu1.b32.cont [12/16] (narrow) %v1093_v55, 8 }
 0x16f   :  { %1206 = vxpose.xlu1.b32.cont [13/16] (narrow) %v1094_v22, 8 }
 0x173   :  { %1207 = vxpose.xlu1.b32.cont [14/16] (narrow) %v1095_v35, 8 }
 0x177   :  { %1208 = vxpose.xlu1.b32.cont [15/16] (narrow) %v1096_v1, 8 }
 0x17b   :  { %1209 = vxpose.xlu1.b32.end [16/16] (narrow) %v1097_v2, 8 }
 0x17f   :  { %v1146_v60 = vpop.trf.xlu1 }
 0x180   :  { %1227 = vst [vmem:[%s2155_s5 + $0x8] sm:$0xff] %v1146_v60 }
 0x19f   :  { %v1178_v16 = vpop.trf.xlu0 }
 0x1a0   :  { %1228 = vst [vmem:[%s2155_s5 + $0x10] sm:$0xff] %v1178_v16 }
 0x1bf   :  { %v1210_v28 = vpop.trf.xlu1 }
 0x1c0   :  { %1229 = vst [vmem:[%s2155_s5 + $0x18] sm:$0xff] %v1210_v28 }

</bundles_post_ra>
